<compile_context>
chip_gen: v6e
topology: v6e:2x2x1
jax: 0.10.0
libtpu: 0.0.40
codegen_flags: <defaults>
</compile_context>

<pallas_src>
import functools
import math

import jax
import jax.numpy as jnp
from jax.experimental import pallas as pl
from jax.experimental.pallas import tpu as pltpu

# ----------------------------- model config ---------------------------------
# Small, shape-consistent instantiation of ConvVSC:
#   input_sz=(3, 32, 32), kernel_szs=[8, 8, 16, 16], hidden_sz=32, latent_sz=8
INPUT_SZ = (3, 32, 32)
KERNEL_SZS = [8, 8, 16, 16]
HIDDEN_SZ = 32
LATENT_SZ = 8
C_CONST = 50.0
CHANNEL_SZS = [INPUT_SZ[0]] + KERNEL_SZS                     # [3, 8, 8, 16, 16]
CONV_OUT_HW = INPUT_SZ[-1] // (2 ** len(KERNEL_SZS))         # 2
CONV_OUTPUT_SZ = (CHANNEL_SZS[-1], CONV_OUT_HW, CONV_OUT_HW) # (16, 2, 2)
FLAT_CONV_OUTPUT_SZ = CONV_OUTPUT_SZ[0] * CONV_OUT_HW * CONV_OUT_HW  # 64


# ----------------------------- Pallas kernels --------------------------------
def _apply_act(acc, act):
    if act == "relu":
        return jnp.maximum(acc, 0.0)
    if act == "sigmoid":
        return jax.nn.sigmoid(acc)
    if act == "none":
        return acc
    raise ValueError(act)


def _gemm_t_kernel(w_ref, p_ref, b_ref, o_ref, *, act):
    """out(Cout, M) = act(W(Cout, K) @ patches(K, M) + b).  bf16 in, f32 acc."""
    acc = jnp.dot(w_ref[...], p_ref[...], preferred_element_type=jnp.float32)
    acc = acc + b_ref[...]                       # b: (Cout, 1), broadcast over lanes
    acc = _apply_act(acc, act)
    o_ref[...] = acc.astype(o_ref.dtype)


def pallas_conv_gemm(w, patches, b, act, out_dtype):
    """w: (Cout, K) bf16, patches: (K, M) bf16, b: (Cout, 1) f32 -> (Cout, M)."""
    Cout, _ = w.shape
    M = patches.shape[1]
    return pl.pallas_call(
        functools.partial(_gemm_t_kernel, act=act),
        out_shape=jax.ShapeDtypeStruct((Cout, M), out_dtype),
        in_specs=[pl.BlockSpec(memory_space=pltpu.MemorySpace.VMEM)] * 3,
        out_specs=pl.BlockSpec(memory_space=pltpu.MemorySpace.VMEM),
    )(w, patches, b)


def _deconv_phase_kernel(w_ref, p_ref, b_ref, o_ref, *, act):
    """One sub-pixel phase of ConvTranspose2d: out(Cout, M) = W_phase @ patches."""
    acc = jnp.dot(w_ref[0], p_ref[0], preferred_element_type=jnp.float32)
    acc = acc + b_ref[...]
    acc = _apply_act(acc, act)
    o_ref[0] = acc.astype(o_ref.dtype)


def _latent_kernel(feats_ref, w1, b1, wm, bm, wv, bv, ws, bs,
                   w2, b2, w3, b3, eps_ref, eta_ref,
                   dec_ref, mu_ref, lv_ref, ls_ref, *, c):
    """Fused features->hidden, 3 heads, VSC reparameterize, latent->features."""
    h = jnp.dot(feats_ref[...], w1[...], preferred_element_type=jnp.float32) + b1[...]
    h = jnp.maximum(h, 0.0)
    mu = jnp.dot(h, wm[...], preferred_element_type=jnp.float32) + bm[...]
    logvar = jnp.dot(h, wv[...], preferred_element_type=jnp.float32) + bv[...]
    logspike = jnp.dot(h, ws[...], preferred_element_type=jnp.float32) + bs[...]
    logspike = jnp.minimum(logspike, 0.0)                 # -relu(-x)
    std = jnp.exp(0.5 * logvar)
    gaussian = eps_ref[...] * std + mu
    selection = jax.nn.sigmoid(c * (eta_ref[...] + jnp.exp(logspike) - 1.0))
    z = selection * gaussian
    f0 = jnp.dot(z, w2[...], preferred_element_type=jnp.float32) + b2[...]
    f0 = jnp.maximum(f0, 0.0)
    f1 = jnp.dot(f0, w3[...], preferred_element_type=jnp.float32) + b3[...]
    f1 = jnp.maximum(f1, 0.0)
    dec_ref[...] = f1
    mu_ref[...] = mu
    lv_ref[...] = logvar
    ls_ref[...] = logspike


def pallas_latent(feats, p, eps, eta, c):
    B = feats.shape[0]
    out_shape = (
        jax.ShapeDtypeStruct((B, FLAT_CONV_OUTPUT_SZ), jnp.float32),
        jax.ShapeDtypeStruct((B, LATENT_SZ), jnp.float32),
        jax.ShapeDtypeStruct((B, LATENT_SZ), jnp.float32),
        jax.ShapeDtypeStruct((B, LATENT_SZ), jnp.float32),
    )
    return pl.pallas_call(
        functools.partial(_latent_kernel, c=float(c)),
        out_shape=out_shape,
        in_specs=[pl.BlockSpec(memory_space=pltpu.MemorySpace.VMEM)] * 15,
        out_specs=tuple(pl.BlockSpec(memory_space=pltpu.MemorySpace.VMEM)
                        for _ in range(4)),
    )(feats, p["f2h_w"], p["f2h_b"], p["mean_w"], p["mean_b"],
      p["logvar_w"], p["logvar_b"], p["logspike_w"], p["logspike_b"],
      p["l2f0_w"], p["l2f0_b"], p["l2f1_w"], p["l2f1_b"], eps, eta)


# ----------------------------- conv layers ------------------------------------
def conv2d_down(x, w_t, b, act, out_dtype):
    """Conv2d(k=4, s=2, p=1).  x: (Cin, N, H, W) bf16, w_t: (Cout, 16*Cin) bf16."""
    Cin, N, H, W = x.shape
    Cout = w_t.shape[0]
    Ho, Wo = H // 2, W // 2
    xp = jnp.pad(x, ((0, 0), (0, 0), (1, 1), (1, 1)))
    # im2col in channel-major layout: K ordering (ky, kx, c); pure reshape, no transpose.
    taps = [xp[:, :, ky:ky + 2 * Ho:2, kx:kx + 2 * Wo:2]
            for ky in range(4) for kx in range(4)]
    patches = jnp.concatenate(taps, axis=0).reshape(16 * Cin, N * Ho * Wo)
    out = pallas_conv_gemm(w_t, patches.astype(jnp.bfloat16), b, act, out_dtype)
    return out.reshape(Cout, N, Ho, Wo)


def conv_transpose2d_up(x, w_ph, b, act, out_dtype):
    """ConvTranspose2d(k=4, s=2, p=1) via 4-phase sub-pixel decomposition.

    x: (Cin, N, H, W) bf16, w_ph: (4, Cout, 4*Cin) bf16, b: (Cout, 1) f32.
    Output phase (py, px): out[:, :, 2i+py, 2j+px] = sum_{dy,dx} xp[:, :, i+py+dy, j+px+dx] * w_phase.
    """
    Cin, N, H, W = x.shape
    Cout = w_ph.shape[1]
    M = N * H * W
    K = 4 * Cin
    xp = jnp.pad(x, ((0, 0), (0, 0), (1, 1), (1, 1)))
    phase_patches = []
    for py in range(2):
        for px in range(2):
            taps = [xp[:, :, py + dy:py + dy + H, px + dx:px + dx + W]
                    for dy in range(2) for dx in range(2)]
            phase_patches.append(
                jnp.concatenate(taps, axis=0).reshape(K, M))
    patches = jnp.stack(phase_patches, axis=0).astype(jnp.bfloat16)   # (4, K, M)

    out = pl.pallas_call(
        functools.partial(_deconv_phase_kernel, act=act),
        out_shape=jax.ShapeDtypeStruct((4, Cout, M), out_dtype),
        grid=(4,),
        in_specs=[
            pl.BlockSpec((1, Cout, K), lambda p: (p, 0, 0)),
            pl.BlockSpec((1, K, M), lambda p: (p, 0, 0)),
            pl.BlockSpec((Cout, 1), lambda p: (0, 0)),
        ],
        out_specs=pl.BlockSpec((1, Cout, M), lambda p: (p, 0, 0)),
        compiler_params=pltpu.CompilerParams(dimension_semantics=("parallel",)),
    )(w_ph, patches, b)

    # Interleave the 4 phases: (4=py*2+px, Cout, N*H*W) -> (Cout, N, 2H, 2W).
    o6 = out.reshape(2, 2, Cout, N, H, W)
    return o6.transpose(2, 3, 4, 0, 5, 1).reshape(Cout, N, 2 * H, 2 * W)


# ----------------------------- parameters ------------------------------------
def init_params(key):
    """PyTorch-layout parameters (Conv2d: (Cout,Cin,4,4); ConvTranspose2d: (Cin,Cout,4,4))."""
    params = {}
    keys = iter(jax.random.split(key, 32))

    def uinit(k, shape, fan_in):
        bound = 1.0 / math.sqrt(fan_in)
        return jax.random.uniform(k, shape, jnp.float32, -bound, bound)

    for i in range(len(KERNEL_SZS)):
        cin, cout = CHANNEL_SZS[i], CHANNEL_SZS[i + 1]
        params[f"conv{i}_w"] = uinit(next(keys), (cout, cin, 4, 4), cin * 16)
        params[f"conv{i}_b"] = uinit(next(keys), (cout,), cin * 16)
    params["f2h_w"] = uinit(next(keys), (FLAT_CONV_OUTPUT_SZ, HIDDEN_SZ), FLAT_CONV_OUTPUT_SZ)
    params["f2h_b"] = uinit(next(keys), (HIDDEN_SZ,), FLAT_CONV_OUTPUT_SZ)
    for name in ("mean", "logvar", "logspike"):
        params[f"{name}_w"] = uinit(next(keys), (HIDDEN_SZ, LATENT_SZ), HIDDEN_SZ)
        params[f"{name}_b"] = uinit(next(keys), (LATENT_SZ,), HIDDEN_SZ)
    params["l2f0_w"] = uinit(next(keys), (LATENT_SZ, HIDDEN_SZ), LATENT_SZ)
    params["l2f0_b"] = uinit(next(keys), (HIDDEN_SZ,), LATENT_SZ)
    params["l2f1_w"] = uinit(next(keys), (HIDDEN_SZ, FLAT_CONV_OUTPUT_SZ), HIDDEN_SZ)
    params["l2f1_b"] = uinit(next(keys), (FLAT_CONV_OUTPUT_SZ,), HIDDEN_SZ)
    n = len(KERNEL_SZS)
    for i in range(n):
        cin = CHANNEL_SZS[n - i]
        cout = CHANNEL_SZS[n - i - 1]
        params[f"deconv{i}_w"] = uinit(next(keys), (cin, cout, 4, 4), cout * 16)
        params[f"deconv{i}_b"] = uinit(next(keys), (cout,), cout * 16)
    return params


def prepare_params(params):
    """One-time relayout into GEMM-ready, bf16 weights (hoisted out of forward)."""
    prep = {}
    n = len(KERNEL_SZS)
    for i in range(n):
        w = params[f"conv{i}_w"]                      # (Cout, Cin, 4, 4)
        cout = w.shape[0]
        # K ordering (ky, kx, cin) to match the channel-major im2col.
        prep[f"conv{i}_w"] = w.transpose(0, 2, 3, 1).reshape(cout, -1).astype(jnp.bfloat16)
        prep[f"conv{i}_b"] = params[f"conv{i}_b"].reshape(cout, 1).astype(jnp.float32)
    for i in range(n):
        w = params[f"deconv{i}_w"]                    # (Cin, Cout, 4, 4)
        cout = w.shape[1]
        phases = []
        for py in range(2):
            for px in range(2):
                taps = [w[:, :, 3 - py - 2 * dy, 3 - px - 2 * dx].T   # (Cout, Cin)
                        for dy in range(2) for dx in range(2)]
                phases.append(jnp.concatenate(taps, axis=1))          # (Cout, 4*Cin)
        prep[f"deconv{i}_w"] = jnp.stack(phases, axis=0).astype(jnp.bfloat16)  # (4,Cout,4Cin)
        prep[f"deconv{i}_b"] = params[f"deconv{i}_b"].reshape(cout, 1).astype(jnp.float32)
    for name in ("f2h", "mean", "logvar", "logspike", "l2f0", "l2f1"):
        prep[f"{name}_w"] = params[f"{name}_w"].astype(jnp.float32)
        prep[f"{name}_b"] = params[f"{name}_b"].reshape(1, -1).astype(jnp.float32)
    return prep


# ----------------------------- forward ---------------------------------------
def conv_vsc_forward(prep, x, rng_key):
    """x: (N, Cin, H, W) f32.  Returns (recon, mu, logvar, logspike)."""
    B = x.shape[0]
    n = len(KERNEL_SZS)

    # --- encode (channel-major activations, bf16) ---
    h = x.transpose(1, 0, 2, 3).astype(jnp.bfloat16)              # (Cin, N, H, W)
    for i in range(n):
        out_dtype = jnp.float32 if i == n - 1 else jnp.bfloat16
        h = conv2d_down(h, prep[f"conv{i}_w"], prep[f"conv{i}_b"], "relu", out_dtype)
    # back to PyTorch .view(-1, flat) ordering (c, h, w) per sample
    feats = h.transpose(1, 0, 2, 3).reshape(B, FLAT_CONV_OUTPUT_SZ)

    # --- fused latent chain (heads + reparameterize + latent_to_features) ---
    k_eps, k_eta = jax.random.split(rng_key)
    eps = jax.random.normal(k_eps, (B, LATENT_SZ), jnp.float32)
    eta = jax.random.uniform(k_eta, (B, LATENT_SZ), jnp.float32)
    dec_feats, mu, logvar, logspike = pallas_latent(feats, prep, eps, eta, C_CONST)

    # --- decode ---
    d = dec_feats.reshape(B, *CONV_OUTPUT_SZ).transpose(1, 0, 2, 3).astype(jnp.bfloat16)
    acts = ["relu"] * (n - 1) + ["sigmoid"]
    for i in range(n):
        out_dtype = jnp.float32 if i == n - 1 else jnp.bfloat16
        d = conv_transpose2d_up(d, prep[f"deconv{i}_w"], prep[f"deconv{i}_b"],
                                acts[i], out_dtype)
    recon = d.transpose(1, 0, 2, 3)                               # (N, 3, 32, 32) f32
    return recon, mu, logvar, logspike


# ----------------------------- main -------------------------------------------
if __name__ == "__main__":
    key = jax.random.PRNGKey(0)
    k_params, k_x, k_noise = jax.random.split(key, 3)

    params = init_params(k_params)
    prep = prepare_params(params)                                  # hoisted weight relayout
    x = jax.random.uniform(k_x, (2,) + INPUT_SZ, jnp.float32)      # (2, 3, 32, 32)

    forward = jax.jit(conv_vsc_forward)
    recon, mu, logvar, logspike = forward(prep, x, k_noise)
    recon = jax.block_until_ready(recon)
    mu = jax.block_until_ready(mu)
    logvar = jax.block_until_ready(logvar)
    logspike = jax.block_until_ready(logspike)

    assert recon.shape == x.shape
    assert mu.shape == (2, LATENT_SZ)
    assert logvar.shape == (2, LATENT_SZ)
    assert logspike.shape == (2, LATENT_SZ)
    assert bool(jnp.all(recon >= 0.0) & jnp.all(recon <= 1.0))     # final sigmoid
    assert bool(jnp.all(logspike <= 0.0))                          # -relu(-x)

    print("KERNEL_OK")
</pallas_src>

<mosaic_0001>
module attributes {stable_mosaic.version = 11 : i64} {
  func.func @_gemm_t_kernel(%arg0: memref<8x48xbf16, #tpu.memory_space<vmem>>, %arg1: memref<48x512xbf16, #tpu.memory_space<vmem>>, %arg2: memref<8x1xf32, #tpu.memory_space<vmem>>, %arg3: memref<8x512xbf16, #tpu.memory_space<vmem>>) attributes {dimension_semantics = [], scalar_prefetch = 0 : i64, scratch_operands = 0 : i64, tpu.core_type = #tpu.core_type<tc>} {
    %c0 = arith.constant 0 : index
    %c0_0 = arith.constant 0 : index
    %0 = vector.load %arg0[%c0, %c0_0] : memref<8x48xbf16, #tpu.memory_space<vmem>>, vector<8x48xbf16>
    %c0_1 = arith.constant 0 : index
    %c0_2 = arith.constant 0 : index
    %1 = vector.load %arg1[%c0_1, %c0_2] : memref<48x512xbf16, #tpu.memory_space<vmem>>, vector<48x512xbf16>
    %cst = arith.constant dense<0.000000e+00> : vector<8x512xf32>
    %2 = tpu.matmul %0, %1, %cst {dimension_numbers = #tpu.dot_dimension_numbers<[1], [0], [0], [1], [0, 0, 1, 1], [], []>} : vector<8x48xbf16>, vector<48x512xbf16>, vector<8x512xf32> -> vector<8x512xf32>
    %c0_3 = arith.constant 0 : index
    %c0_4 = arith.constant 0 : index
    %3 = vector.load %arg2[%c0_3, %c0_4] : memref<8x1xf32, #tpu.memory_space<vmem>>, vector<8x1xf32>
    %4 = vector.broadcast %3 : vector<8x1xf32> to vector<8x512xf32>
    %5 = arith.addf %2, %4 : vector<8x512xf32>
    %cst_5 = arith.constant 0.000000e+00 : f32
    %6 = vector.broadcast %cst_5 : f32 to vector<8x512xf32>
    %7 = arith.maximumf %5, %6 : vector<8x512xf32>
    %8 = arith.truncf %7 : vector<8x512xf32> to vector<8x512xbf16>
    %c0_6 = arith.constant 0 : index
    %c0_7 = arith.constant 0 : index
    %9 = vector.load %arg3[%c0_6, %c0_7] : memref<8x512xbf16, #tpu.memory_space<vmem>>, vector<8x512xbf16>
    tpu.vector_store %arg3[%c0_6, %c0_7], %8 {strides = array<i32>} : memref<8x512xbf16, #tpu.memory_space<vmem>>, vector<8x512xbf16>,
    return
  }
}

module attributes {stable_mosaic.version = 11 : i64} {
  func.func @_gemm_t_kernel(%arg0: memref<8x128xbf16, #tpu.memory_space<vmem>>, %arg1: memref<128x128xbf16, #tpu.memory_space<vmem>>, %arg2: memref<8x1xf32, #tpu.memory_space<vmem>>, %arg3: memref<8x128xbf16, #tpu.memory_space<vmem>>) attributes {dimension_semantics = [], scalar_prefetch = 0 : i64, scratch_operands = 0 : i64, tpu.core_type = #tpu.core_type<tc>} {
    %c0 = arith.constant 0 : index
    %c0_0 = arith.constant 0 : index
    %0 = vector.load %arg0[%c0, %c0_0] : memref<8x128xbf16, #tpu.memory_space<vmem>>, vector<8x128xbf16>
    %c0_1 = arith.constant 0 : index
    %c0_2 = arith.constant 0 : index
    %1 = vector.load %arg1[%c0_1, %c0_2] : memref<128x128xbf16, #tpu.memory_space<vmem>>, vector<128x128xbf16>
    %cst = arith.constant dense<0.000000e+00> : vector<8x128xf32>
    %2 = tpu.matmul %0, %1, %cst {dimension_numbers = #tpu.dot_dimension_numbers<[1], [0], [0], [1], [0, 0, 1, 1], [], []>} : vector<8x128xbf16>, vector<128x128xbf16>, vector<8x128xf32> -> vector<8x128xf32>
    %c0_3 = arith.constant 0 : index
    %c0_4 = arith.constant 0 : index
    %3 = vector.load %arg2[%c0_3, %c0_4] : memref<8x1xf32, #tpu.memory_space<vmem>>, vector<8x1xf32>
    %4 = vector.broadcast %3 : vector<8x1xf32> to vector<8x128xf32>
    %5 = arith.addf %2, %4 : vector<8x128xf32>
    %cst_5 = arith.constant 0.000000e+00 : f32
    %6 = vector.broadcast %cst_5 : f32 to vector<8x128xf32>
    %7 = arith.maximumf %5, %6 : vector<8x128xf32>
    %8 = arith.truncf %7 : vector<8x128xf32> to vector<8x128xbf16>
    %c0_6 = arith.constant 0 : index
    %c0_7 = arith.constant 0 : index
    %9 = vector.load %arg3[%c0_6, %c0_7] : memref<8x128xbf16, #tpu.memory_space<vmem>>, vector<8x128xbf16>
    tpu.vector_store %arg3[%c0_6, %c0_7], %8 {strides = array<i32>} : memref<8x128xbf16, #tpu.memory_space<vmem>>, vector<8x128xbf16>,
    return
  }
}

module attributes {stable_mosaic.version = 11 : i64} {
  func.func @_gemm_t_kernel(%arg0: memref<16x128xbf16, #tpu.memory_space<vmem>>, %arg1: memref<128x32xbf16, #tpu.memory_space<vmem>>, %arg2: memref<16x1xf32, #tpu.memory_space<vmem>>, %arg3: memref<16x32xbf16, #tpu.memory_space<vmem>>) attributes {dimension_semantics = [], scalar_prefetch = 0 : i64, scratch_operands = 0 : i64, tpu.core_type = #tpu.core_type<tc>} {
    %c0 = arith.constant 0 : index
    %c0_0 = arith.constant 0 : index
    %0 = vector.load %arg0[%c0, %c0_0] : memref<16x128xbf16, #tpu.memory_space<vmem>>, vector<16x128xbf16>
    %c0_1 = arith.constant 0 : index
    %c0_2 = arith.constant 0 : index
    %1 = vector.load %arg1[%c0_1, %c0_2] : memref<128x32xbf16, #tpu.memory_space<vmem>>, vector<128x32xbf16>
    %cst = arith.constant dense<0.000000e+00> : vector<16x32xf32>
    %2 = tpu.matmul %0, %1, %cst {dimension_numbers = #tpu.dot_dimension_numbers<[1], [0], [0], [1], [0, 0, 1, 1], [], []>} : vector<16x128xbf16>, vector<128x32xbf16>, vector<16x32xf32> -> vector<16x32xf32>
    %c0_3 = arith.constant 0 : index
    %c0_4 = arith.constant 0 : index
    %3 = vector.load %arg2[%c0_3, %c0_4] : memref<16x1xf32, #tpu.memory_space<vmem>>, vector<16x1xf32>
    %4 = vector.broadcast %3 : vector<16x1xf32> to vector<16x32xf32>
    %5 = arith.addf %2, %4 : vector<16x32xf32>
    %cst_5 = arith.constant 0.000000e+00 : f32
    %6 = vector.broadcast %cst_5 : f32 to vector<16x32xf32>
    %7 = arith.maximumf %5, %6 : vector<16x32xf32>
    %8 = arith.truncf %7 : vector<16x32xf32> to vector<16x32xbf16>
    %c0_6 = arith.constant 0 : index
    %c0_7 = arith.constant 0 : index
    %9 = vector.load %arg3[%c0_6, %c0_7] : memref<16x32xbf16, #tpu.memory_space<vmem>>, vector<16x32xbf16>
    tpu.vector_store %arg3[%c0_6, %c0_7], %8 {strides = array<i32>} : memref<16x32xbf16, #tpu.memory_space<vmem>>, vector<16x32xbf16>,
    return
  }
}

module attributes {stable_mosaic.version = 11 : i64} {
  func.func @_gemm_t_kernel(%arg0: memref<16x256xbf16, #tpu.memory_space<vmem>>, %arg1: memref<256x8xbf16, #tpu.memory_space<vmem>>, %arg2: memref<16x1xf32, #tpu.memory_space<vmem>>, %arg3: memref<16x8xf32, #tpu.memory_space<vmem>>) attributes {dimension_semantics = [], scalar_prefetch = 0 : i64, scratch_operands = 0 : i64, tpu.core_type = #tpu.core_type<tc>} {
    %c0 = arith.constant 0 : index
    %c0_0 = arith.constant 0 : index
    %0 = vector.load %arg0[%c0, %c0_0] : memref<16x256xbf16, #tpu.memory_space<vmem>>, vector<16x256xbf16>
    %c0_1 = arith.constant 0 : index
    %c0_2 = arith.constant 0 : index
    %1 = vector.load %arg1[%c0_1, %c0_2] : memref<256x8xbf16, #tpu.memory_space<vmem>>, vector<256x8xbf16>
    %cst = arith.constant dense<0.000000e+00> : vector<16x8xf32>
    %2 = tpu.matmul %0, %1, %cst {dimension_numbers = #tpu.dot_dimension_numbers<[1], [0], [0], [1], [0, 0, 1, 1], [], []>} : vector<16x256xbf16>, vector<256x8xbf16>, vector<16x8xf32> -> vector<16x8xf32>
    %c0_3 = arith.constant 0 : index
    %c0_4 = arith.constant 0 : index
    %3 = vector.load %arg2[%c0_3, %c0_4] : memref<16x1xf32, #tpu.memory_space<vmem>>, vector<16x1xf32>
    %4 = vector.broadcast %3 : vector<16x1xf32> to vector<16x8xf32>
    %5 = arith.addf %2, %4 : vector<16x8xf32>
    %cst_5 = arith.constant 0.000000e+00 : f32
    %6 = vector.broadcast %cst_5 : f32 to vector<16x8xf32>
    %7 = arith.maximumf %5, %6 : vector<16x8xf32>
    %c0_6 = arith.constant 0 : index
    %c0_7 = arith.constant 0 : index
    %8 = vector.load %arg3[%c0_6, %c0_7] : memref<16x8xf32, #tpu.memory_space<vmem>>, vector<16x8xf32>
    tpu.vector_store %arg3[%c0_6, %c0_7], %7 {strides = array<i32>} : memref<16x8xf32, #tpu.memory_space<vmem>>, vector<16x8xf32>,
    return
  }
}

module attributes {stable_mosaic.version = 11 : i64} {
  func.func @_latent_kernel(%arg0: memref<2x64xf32, #tpu.memory_space<vmem>>, %arg1: memref<64x32xf32, #tpu.memory_space<vmem>>, %arg2: memref<1x32xf32, #tpu.memory_space<vmem>>, %arg3: memref<32x8xf32, #tpu.memory_space<vmem>>, %arg4: memref<1x8xf32, #tpu.memory_space<vmem>>, %arg5: memref<32x8xf32, #tpu.memory_space<vmem>>, %arg6: memref<1x8xf32, #tpu.memory_space<vmem>>, %arg7: memref<32x8xf32, #tpu.memory_space<vmem>>, %arg8: memref<1x8xf32, #tpu.memory_space<vmem>>, %arg9: memref<8x32xf32, #tpu.memory_space<vmem>>, %arg10: memref<1x32xf32, #tpu.memory_space<vmem>>, %arg11: memref<32x64xf32, #tpu.memory_space<vmem>>, %arg12: memref<1x64xf32, #tpu.memory_space<vmem>>, %arg13: memref<2x8xf32, #tpu.memory_space<vmem>>, %arg14: memref<2x8xf32, #tpu.memory_space<vmem>>, %arg15: memref<2x64xf32, #tpu.memory_space<vmem>>, %arg16: memref<2x8xf32, #tpu.memory_space<vmem>>, %arg17: memref<2x8xf32, #tpu.memory_space<vmem>>, %arg18: memref<2x8xf32, #tpu.memory_space<vmem>>) attributes {dimension_semantics = [], scalar_prefetch = 0 : i64, scratch_operands = 0 : i64, tpu.core_type = #tpu.core_type<tc>} {
    %c0 = arith.constant 0 : index
    %c0_0 = arith.constant 0 : index
    %0 = vector.load %arg0[%c0, %c0_0] : memref<2x64xf32, #tpu.memory_space<vmem>>, vector<2x64xf32>
    %c0_1 = arith.constant 0 : index
    %c0_2 = arith.constant 0 : index
    %1 = vector.load %arg1[%c0_1, %c0_2] : memref<64x32xf32, #tpu.memory_space<vmem>>, vector<64x32xf32>
    %cst = arith.constant dense<0.000000e+00> : vector<2x32xf32>
    %2 = tpu.matmul %0, %1, %cst {dimension_numbers = #tpu.dot_dimension_numbers<[1], [0], [0], [1], [0, 0, 1, 1], [], []>} : vector<2x64xf32>, vector<64x32xf32>, vector<2x32xf32> -> vector<2x32xf32>
    %c0_3 = arith.constant 0 : index
    %c0_4 = arith.constant 0 : index
    %3 = vector.load %arg2[%c0_3, %c0_4] : memref<1x32xf32, #tpu.memory_space<vmem>>, vector<1x32xf32>
    %4 = vector.broadcast %3 : vector<1x32xf32> to vector<2x32xf32>
    %5 = arith.addf %2, %4 : vector<2x32xf32>
    %cst_5 = arith.constant 0.000000e+00 : f32
    %6 = vector.broadcast %cst_5 : f32 to vector<2x32xf32>
    %7 = arith.maximumf %5, %6 : vector<2x32xf32>
    %c0_6 = arith.constant 0 : index
    %c0_7 = arith.constant 0 : index
    %8 = vector.load %arg3[%c0_6, %c0_7] : memref<32x8xf32, #tpu.memory_space<vmem>>, vector<32x8xf32>
    %cst_8 = arith.constant dense<0.000000e+00> : vector<2x8xf32>
    %9 = tpu.matmul %7, %8, %cst_8 {dimension_numbers = #tpu.dot_dimension_numbers<[1], [0], [0], [1], [0, 0, 1, 1], [], []>} : vector<2x32xf32>, vector<32x8xf32>, vector<2x8xf32> -> vector<2x8xf32>
    %c0_9 = arith.constant 0 : index
    %c0_10 = arith.constant 0 : index
    %10 = vector.load %arg4[%c0_9, %c0_10] : memref<1x8xf32, #tpu.memory_space<vmem>>, vector<1x8xf32>
    %11 = vector.broadcast %10 : vector<1x8xf32> to vector<2x8xf32>
    %12 = arith.addf %9, %11 : vector<2x8xf32>
    %c0_11 = arith.constant 0 : index
    %c0_12 = arith.constant 0 : index
    %13 = vector.load %arg5[%c0_11, %c0_12] : memref<32x8xf32, #tpu.memory_space<vmem>>, vector<32x8xf32>
    %cst_13 = arith.constant dense<0.000000e+00> : vector<2x8xf32>
    %14 = tpu.matmul %7, %13, %cst_13 {dimension_numbers = #tpu.dot_dimension_numbers<[1], [0], [0], [1], [0, 0, 1, 1], [], []>} : vector<2x32xf32>, vector<32x8xf32>, vector<2x8xf32> -> vector<2x8xf32>
    %c0_14 = arith.constant 0 : index
    %c0_15 = arith.constant 0 : index
    %15 = vector.load %arg6[%c0_14, %c0_15] : memref<1x8xf32, #tpu.memory_space<vmem>>, vector<1x8xf32>
    %16 = vector.broadcast %15 : vector<1x8xf32> to vector<2x8xf32>
    %17 = arith.addf %14, %16 : vector<2x8xf32>
    %c0_16 = arith.constant 0 : index
    %c0_17 = arith.constant 0 : index
    %18 = vector.load %arg7[%c0_16, %c0_17] : memref<32x8xf32, #tpu.memory_space<vmem>>, vector<32x8xf32>
    %cst_18 = arith.constant dense<0.000000e+00> : vector<2x8xf32>
    %19 = tpu.matmul %7, %18, %cst_18 {dimension_numbers = #tpu.dot_dimension_numbers<[1], [0], [0], [1], [0, 0, 1, 1], [], []>} : vector<2x32xf32>, vector<32x8xf32>, vector<2x8xf32> -> vector<2x8xf32>
    %c0_19 = arith.constant 0 : index
    %c0_20 = arith.constant 0 : index
    %20 = vector.load %arg8[%c0_19, %c0_20] : memref<1x8xf32, #tpu.memory_space<vmem>>, vector<1x8xf32>
    %21 = vector.broadcast %20 : vector<1x8xf32> to vector<2x8xf32>
    %22 = arith.addf %19, %21 : vector<2x8xf32>
    %cst_21 = arith.constant 0.000000e+00 : f32
    %23 = vector.broadcast %cst_21 : f32 to vector<2x8xf32>
    %24 = arith.minimumf %22, %23 : vector<2x8xf32>
    %cst_22 = arith.constant 5.000000e-01 : f32
    %25 = vector.broadcast %cst_22 : f32 to vector<2x8xf32>
    %26 = arith.mulf %25, %17 : vector<2x8xf32>
    %27 = math.exp %26 : vector<2x8xf32>
    %c0_23 = arith.constant 0 : index
    %c0_24 = arith.constant 0 : index
    %28 = vector.load %arg13[%c0_23, %c0_24] : memref<2x8xf32, #tpu.memory_space<vmem>>, vector<2x8xf32>
    %29 = arith.mulf %28, %27 : vector<2x8xf32>
    %30 = arith.addf %29, %12 : vector<2x8xf32>
    %c0_25 = arith.constant 0 : index
    %c0_26 = arith.constant 0 : index
    %31 = vector.load %arg14[%c0_25, %c0_26] : memref<2x8xf32, #tpu.memory_space<vmem>>, vector<2x8xf32>
    %32 = math.exp %24 : vector<2x8xf32>
    %33 = arith.addf %31, %32 : vector<2x8xf32>
    %cst_27 = arith.constant 1.000000e+00 : f32
    %34 = vector.broadcast %cst_27 : f32 to vector<2x8xf32>
    %35 = arith.subf %33, %34 : vector<2x8xf32>
    %cst_28 = arith.constant 5.000000e+01 : f32
    %36 = vector.broadcast %cst_28 : f32 to vector<2x8xf32>
    %37 = arith.mulf %36, %35 : vector<2x8xf32>
    %38 = arith.negf %37 : vector<2x8xf32>
    %39 = math.exp %38 : vector<2x8xf32>
    %cst_29 = arith.constant 1.000000e+00 : f32
    %40 = vector.broadcast %cst_29 : f32 to vector<2x8xf32>
    %41 = arith.addf %40, %39 : vector<2x8xf32>
    %42 = arith.divf %40, %41 : vector<2x8xf32>
    %43 = arith.mulf %42, %30 : vector<2x8xf32>
    %c0_30 = arith.constant 0 : index
    %c0_31 = arith.constant 0 : index
    %44 = vector.load %arg9[%c0_30, %c0_31] : memref<8x32xf32, #tpu.memory_space<vmem>>, vector<8x32xf32>
    %cst_32 = arith.constant dense<0.000000e+00> : vector<2x32xf32>
    %45 = tpu.matmul %43, %44, %cst_32 {dimension_numbers = #tpu.dot_dimension_numbers<[1], [0], [0], [1], [0, 0, 1, 1], [], []>} : vector<2x8xf32>, vector<8x32xf32>, vector<2x32xf32> -> vector<2x32xf32>
    %c0_33 = arith.constant 0 : index
    %c0_34 = arith.constant 0 : index
    %46 = vector.load %arg10[%c0_33, %c0_34] : memref<1x32xf32, #tpu.memory_space<vmem>>, vector<1x32xf32>
    %47 = vector.broadcast %46 : vector<1x32xf32> to vector<2x32xf32>
    %48 = arith.addf %45, %47 : vector<2x32xf32>
    %cst_35 = arith.constant 0.000000e+00 : f32
    %49 = vector.broadcast %cst_35 : f32 to vector<2x32xf32>
    %50 = arith.maximumf %48, %49 : vector<2x32xf32>
    %c0_36 = arith.constant 0 : index
    %c0_37 = arith.constant 0 : index
    %51 = vector.load %arg11[%c0_36, %c0_37] : memref<32x64xf32, #tpu.memory_space<vmem>>, vector<32x64xf32>
    %cst_38 = arith.constant dense<0.000000e+00> : vector<2x64xf32>
    %52 = tpu.matmul %50, %51, %cst_38 {dimension_numbers = #tpu.dot_dimension_numbers<[1], [0], [0], [1], [0, 0, 1, 1], [], []>} : vector<2x32xf32>, vector<32x64xf32>, vector<2x64xf32> -> vector<2x64xf32>
    %c0_39 = arith.constant 0 : index
    %c0_40 = arith.constant 0 : index
    %53 = vector.load %arg12[%c0_39, %c0_40] : memref<1x64xf32, #tpu.memory_space<vmem>>, vector<1x64xf32>
    %54 = vector.broadcast %53 : vector<1x64xf32> to vector<2x64xf32>
    %55 = arith.addf %52, %54 : vector<2x64xf32>
    %cst_41 = arith.constant 0.000000e+00 : f32
    %56 = vector.broadcast %cst_41 : f32 to vector<2x64xf32>
    %57 = arith.maximumf %55, %56 : vector<2x64xf32>
    %c0_42 = arith.constant 0 : index
    %c0_43 = arith.constant 0 : index
    %58 = vector.load %arg15[%c0_42, %c0_43] : memref<2x64xf32, #tpu.memory_space<vmem>>, vector<2x64xf32>
    tpu.vector_store %arg15[%c0_42, %c0_43], %57 {strides = array<i32>} : memref<2x64xf32, #tpu.memory_space<vmem>>, vector<2x64xf32>,
    %c0_44 = arith.constant 0 : index
    %c0_45 = arith.constant 0 : index
    %59 = vector.load %arg16[%c0_44, %c0_45] : memref<2x8xf32, #tpu.memory_space<vmem>>, vector<2x8xf32>
    tpu.vector_store %arg16[%c0_44, %c0_45], %12 {strides = array<i32>} : memref<2x8xf32, #tpu.memory_space<vmem>>, vector<2x8xf32>,
    %c0_46 = arith.constant 0 : index
    %c0_47 = arith.constant 0 : index
    %60 = vector.load %arg17[%c0_46, %c0_47] : memref<2x8xf32, #tpu.memory_space<vmem>>, vector<2x8xf32>
    tpu.vector_store %arg17[%c0_46, %c0_47], %17 {strides = array<i32>} : memref<2x8xf32, #tpu.memory_space<vmem>>, vector<2x8xf32>,
    %c0_48 = arith.constant 0 : index
    %c0_49 = arith.constant 0 : index
    %61 = vector.load %arg18[%c0_48, %c0_49] : memref<2x8xf32, #tpu.memory_space<vmem>>, vector<2x8xf32>
    tpu.vector_store %arg18[%c0_48, %c0_49], %24 {strides = array<i32>} : memref<2x8xf32, #tpu.memory_space<vmem>>, vector<2x8xf32>,
    return
  }
}

module attributes {stable_mosaic.version = 11 : i64} {
  func.func @_deconv_phase_kernel(%arg0: i32, %arg1: memref<1x16x64xbf16, #tpu.memory_space<vmem>>, %arg2: memref<1x64x8xbf16, #tpu.memory_space<vmem>>, %arg3: memref<16x1xf32, #tpu.memory_space<vmem>>, %arg4: memref<1x16x8xbf16, #tpu.memory_space<vmem>>) attributes {dimension_semantics = [#tpu.dimension_semantics<parallel>], iteration_bounds = array<i64: 4>, scalar_prefetch = 0 : i64, scratch_operands = 0 : i64, tpu.core_type = #tpu.core_type<tc>, window_params = [{transform_indices = @transform_0, window_bounds = array<i64: 1, 16, 64>}, {transform_indices = @transform_1, window_bounds = array<i64: 1, 64, 8>}, {pipeline_mode = #tpu.pipeline_mode<synchronous>, transform_indices = @transform_2, window_bounds = array<i64: 16, 1>}, {transform_indices = @transform_3, window_bounds = array<i64: 1, 16, 8>}]} {
    %c0 = arith.constant 0 : index
    %c0_0 = arith.constant 0 : index
    %c0_1 = arith.constant 0 : index
    %0 = vector.load %arg1[%c0, %c0_0, %c0_1] : memref<1x16x64xbf16, #tpu.memory_space<vmem>>, vector<1x16x64xbf16>
    %1 = vector.shape_cast %0 : vector<1x16x64xbf16> to vector<16x64xbf16>
    %c0_2 = arith.constant 0 : index
    %c0_3 = arith.constant 0 : index
    %c0_4 = arith.constant 0 : index
    %2 = vector.load %arg2[%c0_2, %c0_3, %c0_4] : memref<1x64x8xbf16, #tpu.memory_space<vmem>>, vector<1x64x8xbf16>
    %3 = vector.shape_cast %2 : vector<1x64x8xbf16> to vector<64x8xbf16>
    %cst = arith.constant dense<0.000000e+00> : vector<16x8xf32>
    %4 = tpu.matmul %1, %3, %cst {dimension_numbers = #tpu.dot_dimension_numbers<[1], [0], [0], [1], [0, 0, 1, 1], [], []>} : vector<16x64xbf16>, vector<64x8xbf16>, vector<16x8xf32> -> vector<16x8xf32>
    %c0_5 = arith.constant 0 : index
    %c0_6 = arith.constant 0 : index
    %5 = vector.load %arg3[%c0_5, %c0_6] : memref<16x1xf32, #tpu.memory_space<vmem>>, vector<16x1xf32>
    %6 = vector.broadcast %5 : vector<16x1xf32> to vector<16x8xf32>
    %7 = arith.addf %4, %6 : vector<16x8xf32>
    %cst_7 = arith.constant 0.000000e+00 : f32
    %8 = vector.broadcast %cst_7 : f32 to vector<16x8xf32>
    %9 = arith.maximumf %7, %8 : vector<16x8xf32>
    %10 = arith.truncf %9 : vector<16x8xf32> to vector<16x8xbf16>
    %c0_8 = arith.constant 0 : index
    %c0_9 = arith.constant 0 : index
    %c0_10 = arith.constant 0 : index
    %11 = vector.load %arg4[%c0_8, %c0_9, %c0_10] : memref<1x16x8xbf16, #tpu.memory_space<vmem>>, vector<1x16x8xbf16>
    %12 = vector.shape_cast %11 : vector<1x16x8xbf16> to vector<16x8xbf16>
    %13 = vector.shape_cast %10 : vector<16x8xbf16> to vector<1x16x8xbf16>
    tpu.vector_store %arg4[%c0_8, %c0_9, %c0_10], %13 {strides = array<i32>} : memref<1x16x8xbf16, #tpu.memory_space<vmem>>, vector<1x16x8xbf16>,
    return
  }
  func.func @transform_0(%arg0: i32) -> (i32, i32, i32) {
    %c0_i32 = arith.constant 0 : i32
    %c0_i32_0 = arith.constant 0 : i32
    %c0_i32_1 = arith.constant 0 : i32
    return %arg0, %c0_i32, %c0_i32_0 : i32, i32, i32
  }
  func.func @transform_1(%arg0: i32) -> (i32, i32, i32) {
    %c0_i32 = arith.constant 0 : i32
    %c0_i32_0 = arith.constant 0 : i32
    %c0_i32_1 = arith.constant 0 : i32
    return %arg0, %c0_i32, %c0_i32_0 : i32, i32, i32
  }
  func.func @transform_2(%arg0: i32) -> (i32, i32) {
    %c0_i32 = arith.constant 0 : i32
    %c0_i32_0 = arith.constant 0 : i32
    %c0_i32_1 = arith.constant 0 : i32
    return %c0_i32, %c0_i32_0 : i32, i32
  }
  func.func @transform_3(%arg0: i32) -> (i32, i32, i32) {
    %c0_i32 = arith.constant 0 : i32
    %c0_i32_0 = arith.constant 0 : i32
    %c0_i32_1 = arith.constant 0 : i32
    return %arg0, %c0_i32, %c0_i32_0 : i32, i32, i32
  }
}

module attributes {stable_mosaic.version = 11 : i64} {
  func.func @_deconv_phase_kernel(%arg0: i32, %arg1: memref<1x8x64xbf16, #tpu.memory_space<vmem>>, %arg2: memref<1x64x32xbf16, #tpu.memory_space<vmem>>, %arg3: memref<8x1xf32, #tpu.memory_space<vmem>>, %arg4: memref<1x8x32xbf16, #tpu.memory_space<vmem>>) attributes {dimension_semantics = [#tpu.dimension_semantics<parallel>], iteration_bounds = array<i64: 4>, scalar_prefetch = 0 : i64, scratch_operands = 0 : i64, tpu.core_type = #tpu.core_type<tc>, window_params = [{transform_indices = @transform_0, window_bounds = array<i64: 1, 8, 64>}, {transform_indices = @transform_1, window_bounds = array<i64: 1, 64, 32>}, {pipeline_mode = #tpu.pipeline_mode<synchronous>, transform_indices = @transform_2, window_bounds = array<i64: 8, 1>}, {transform_indices = @transform_3, window_bounds = array<i64: 1, 8, 32>}]} {
    %c0 = arith.constant 0 : index
    %c0_0 = arith.constant 0 : index
    %c0_1 = arith.constant 0 : index
    %0 = vector.load %arg1[%c0, %c0_0, %c0_1] : memref<1x8x64xbf16, #tpu.memory_space<vmem>>, vector<1x8x64xbf16>
    %1 = vector.shape_cast %0 : vector<1x8x64xbf16> to vector<8x64xbf16>
    %c0_2 = arith.constant 0 : index
    %c0_3 = arith.constant 0 : index
    %c0_4 = arith.constant 0 : index
    %2 = vector.load %arg2[%c0_2, %c0_3, %c0_4] : memref<1x64x32xbf16, #tpu.memory_space<vmem>>, vector<1x64x32xbf16>
    %3 = vector.shape_cast %2 : vector<1x64x32xbf16> to vector<64x32xbf16>
    %cst = arith.constant dense<0.000000e+00> : vector<8x32xf32>
    %4 = tpu.matmul %1, %3, %cst {dimension_numbers = #tpu.dot_dimension_numbers<[1], [0], [0], [1], [0, 0, 1, 1], [], []>} : vector<8x64xbf16>, vector<64x32xbf16>, vector<8x32xf32> -> vector<8x32xf32>
    %c0_5 = arith.constant 0 : index
    %c0_6 = arith.constant 0 : index
    %5 = vector.load %arg3[%c0_5, %c0_6] : memref<8x1xf32, #tpu.memory_space<vmem>>, vector<8x1xf32>
    %6 = vector.broadcast %5 : vector<8x1xf32> to vector<8x32xf32>
    %7 = arith.addf %4, %6 : vector<8x32xf32>
    %cst_7 = arith.constant 0.000000e+00 : f32
    %8 = vector.broadcast %cst_7 : f32 to vector<8x32xf32>
    %9 = arith.maximumf %7, %8 : vector<8x32xf32>
    %10 = arith.truncf %9 : vector<8x32xf32> to vector<8x32xbf16>
    %c0_8 = arith.constant 0 : index
    %c0_9 = arith.constant 0 : index
    %c0_10 = arith.constant 0 : index
    %11 = vector.load %arg4[%c0_8, %c0_9, %c0_10] : memref<1x8x32xbf16, #tpu.memory_space<vmem>>, vector<1x8x32xbf16>
    %12 = vector.shape_cast %11 : vector<1x8x32xbf16> to vector<8x32xbf16>
    %13 = vector.shape_cast %10 : vector<8x32xbf16> to vector<1x8x32xbf16>
    tpu.vector_store %arg4[%c0_8, %c0_9, %c0_10], %13 {strides = array<i32>} : memref<1x8x32xbf16, #tpu.memory_space<vmem>>, vector<1x8x32xbf16>,
    return
  }
  func.func @transform_0(%arg0: i32) -> (i32, i32, i32) {
    %c0_i32 = arith.constant 0 : i32
    %c0_i32_0 = arith.constant 0 : i32
    %c0_i32_1 = arith.constant 0 : i32
    return %arg0, %c0_i32, %c0_i32_0 : i32, i32, i32
  }
  func.func @transform_1(%arg0: i32) -> (i32, i32, i32) {
    %c0_i32 = arith.constant 0 : i32
    %c0_i32_0 = arith.constant 0 : i32
    %c0_i32_1 = arith.constant 0 : i32
    return %arg0, %c0_i32, %c0_i32_0 : i32, i32, i32
  }
  func.func @transform_2(%arg0: i32) -> (i32, i32) {
    %c0_i32 = arith.constant 0 : i32
    %c0_i32_0 = arith.constant 0 : i32
    %c0_i32_1 = arith.constant 0 : i32
    return %c0_i32, %c0_i32_0 : i32, i32
  }
  func.func @transform_3(%arg0: i32) -> (i32, i32, i32) {
    %c0_i32 = arith.constant 0 : i32
    %c0_i32_0 = arith.constant 0 : i32
    %c0_i32_1 = arith.constant 0 : i32
    return %arg0, %c0_i32, %c0_i32_0 : i32, i32, i32
  }
}

module attributes {stable_mosaic.version = 11 : i64} {
  func.func @_deconv_phase_kernel(%arg0: i32, %arg1: memref<1x8x32xbf16, #tpu.memory_space<vmem>>, %arg2: memref<1x32x128xbf16, #tpu.memory_space<vmem>>, %arg3: memref<8x1xf32, #tpu.memory_space<vmem>>, %arg4: memref<1x8x128xbf16, #tpu.memory_space<vmem>>) attributes {dimension_semantics = [#tpu.dimension_semantics<parallel>], iteration_bounds = array<i64: 4>, scalar_prefetch = 0 : i64, scratch_operands = 0 : i64, tpu.core_type = #tpu.core_type<tc>, window_params = [{transform_indices = @transform_0, window_bounds = array<i64: 1, 8, 32>}, {transform_indices = @transform_1, window_bounds = array<i64: 1, 32, 128>}, {pipeline_mode = #tpu.pipeline_mode<synchronous>, transform_indices = @transform_2, window_bounds = array<i64: 8, 1>}, {transform_indices = @transform_3, window_bounds = array<i64: 1, 8, 128>}]} {
    %c0 = arith.constant 0 : index
    %c0_0 = arith.constant 0 : index
    %c0_1 = arith.constant 0 : index
    %0 = vector.load %arg1[%c0, %c0_0, %c0_1] : memref<1x8x32xbf16, #tpu.memory_space<vmem>>, vector<1x8x32xbf16>
    %1 = vector.shape_cast %0 : vector<1x8x32xbf16> to vector<8x32xbf16>
    %c0_2 = arith.constant 0 : index
    %c0_3 = arith.constant 0 : index
    %c0_4 = arith.constant 0 : index
    %2 = vector.load %arg2[%c0_2, %c0_3, %c0_4] : memref<1x32x128xbf16, #tpu.memory_space<vmem>>, vector<1x32x128xbf16>
    %3 = vector.shape_cast %2 : vector<1x32x128xbf16> to vector<32x128xbf16>
    %cst = arith.constant dense<0.000000e+00> : vector<8x128xf32>
    %4 = tpu.matmul %1, %3, %cst {dimension_numbers = #tpu.dot_dimension_numbers<[1], [0], [0], [1], [0, 0, 1, 1], [], []>} : vector<8x32xbf16>, vector<32x128xbf16>, vector<8x128xf32> -> vector<8x128xf32>
    %c0_5 = arith.constant 0 : index
    %c0_6 = arith.constant 0 : index
    %5 = vector.load %arg3[%c0_5, %c0_6] : memref<8x1xf32, #tpu.memory_space<vmem>>, vector<8x1xf32>
    %6 = vector.broadcast %5 : vector<8x1xf32> to vector<8x128xf32>
    %7 = arith.addf %4, %6 : vector<8x128xf32>
    %cst_7 = arith.constant 0.000000e+00 : f32
    %8 = vector.broadcast %cst_7 : f32 to vector<8x128xf32>
    %9 = arith.maximumf %7, %8 : vector<8x128xf32>
    %10 = arith.truncf %9 : vector<8x128xf32> to vector<8x128xbf16>
    %c0_8 = arith.constant 0 : index
    %c0_9 = arith.constant 0 : index
    %c0_10 = arith.constant 0 : index
    %11 = vector.load %arg4[%c0_8, %c0_9, %c0_10] : memref<1x8x128xbf16, #tpu.memory_space<vmem>>, vector<1x8x128xbf16>
    %12 = vector.shape_cast %11 : vector<1x8x128xbf16> to vector<8x128xbf16>
    %13 = vector.shape_cast %10 : vector<8x128xbf16> to vector<1x8x128xbf16>
    tpu.vector_store %arg4[%c0_8, %c0_9, %c0_10], %13 {strides = array<i32>} : memref<1x8x128xbf16, #tpu.memory_space<vmem>>, vector<1x8x128xbf16>,
    return
  }
  func.func @transform_0(%arg0: i32) -> (i32, i32, i32) {
    %c0_i32 = arith.constant 0 : i32
    %c0_i32_0 = arith.constant 0 : i32
    %c0_i32_1 = arith.constant 0 : i32
    return %arg0, %c0_i32, %c0_i32_0 : i32, i32, i32
  }
  func.func @transform_1(%arg0: i32) -> (i32, i32, i32) {
    %c0_i32 = arith.constant 0 : i32
    %c0_i32_0 = arith.constant 0 : i32
    %c0_i32_1 = arith.constant 0 : i32
    return %arg0, %c0_i32, %c0_i32_0 : i32, i32, i32
  }
  func.func @transform_2(%arg0: i32) -> (i32, i32) {
    %c0_i32 = arith.constant 0 : i32
    %c0_i32_0 = arith.constant 0 : i32
    %c0_i32_1 = arith.constant 0 : i32
    return %c0_i32, %c0_i32_0 : i32, i32
  }
  func.func @transform_3(%arg0: i32) -> (i32, i32, i32) {
    %c0_i32 = arith.constant 0 : i32
    %c0_i32_0 = arith.constant 0 : i32
    %c0_i32_1 = arith.constant 0 : i32
    return %arg0, %c0_i32, %c0_i32_0 : i32, i32, i32
  }
}

module attributes {stable_mosaic.version = 11 : i64} {
  func.func @_deconv_phase_kernel(%arg0: i32, %arg1: memref<1x3x32xbf16, #tpu.memory_space<vmem>>, %arg2: memref<1x32x512xbf16, #tpu.memory_space<vmem>>, %arg3: memref<3x1xf32, #tpu.memory_space<vmem>>, %arg4: memref<1x3x512xf32, #tpu.memory_space<vmem>>) attributes {dimension_semantics = [#tpu.dimension_semantics<parallel>], iteration_bounds = array<i64: 4>, scalar_prefetch = 0 : i64, scratch_operands = 0 : i64, tpu.core_type = #tpu.core_type<tc>, window_params = [{transform_indices = @transform_0, window_bounds = array<i64: 1, 3, 32>}, {transform_indices = @transform_1, window_bounds = array<i64: 1, 32, 512>}, {pipeline_mode = #tpu.pipeline_mode<synchronous>, transform_indices = @transform_2, window_bounds = array<i64: 3, 1>}, {transform_indices = @transform_3, window_bounds = array<i64: 1, 3, 512>}]} {
    %c0 = arith.constant 0 : index
    %c0_0 = arith.constant 0 : index
    %c0_1 = arith.constant 0 : index
    %0 = vector.load %arg1[%c0, %c0_0, %c0_1] : memref<1x3x32xbf16, #tpu.memory_space<vmem>>, vector<1x3x32xbf16>
    %1 = vector.shape_cast %0 : vector<1x3x32xbf16> to vector<3x32xbf16>
    %c0_2 = arith.constant 0 : index
    %c0_3 = arith.constant 0 : index
    %c0_4 = arith.constant 0 : index
    %2 = vector.load %arg2[%c0_2, %c0_3, %c0_4] : memref<1x32x512xbf16, #tpu.memory_space<vmem>>, vector<1x32x512xbf16>
    %3 = vector.shape_cast %2 : vector<1x32x512xbf16> to vector<32x512xbf16>
    %cst = arith.constant dense<0.000000e+00> : vector<3x512xf32>
    %4 = tpu.matmul %1, %3, %cst {dimension_numbers = #tpu.dot_dimension_numbers<[1], [0], [0], [1], [0, 0, 1, 1], [], []>} : vector<3x32xbf16>, vector<32x512xbf16>, vector<3x512xf32> -> vector<3x512xf32>
    %c0_5 = arith.constant 0 : index
    %c0_6 = arith.constant 0 : index
    %5 = vector.load %arg3[%c0_5, %c0_6] : memref<3x1xf32, #tpu.memory_space<vmem>>, vector<3x1xf32>
    %6 = vector.broadcast %5 : vector<3x1xf32> to vector<3x512xf32>
    %7 = arith.addf %4, %6 : vector<3x512xf32>
    %8 = arith.negf %7 : vector<3x512xf32>
    %9 = math.exp %8 : vector<3x512xf32>
    %cst_7 = arith.constant 1.000000e+00 : f32
    %10 = vector.broadcast %cst_7 : f32 to vector<3x512xf32>
    %11 = arith.addf %10, %9 : vector<3x512xf32>
    %12 = arith.divf %10, %11 : vector<3x512xf32>
    %c0_8 = arith.constant 0 : index
    %c0_9 = arith.constant 0 : index
    %c0_10 = arith.constant 0 : index
    %13 = vector.load %arg4[%c0_8, %c0_9, %c0_10] : memref<1x3x512xf32, #tpu.memory_space<vmem>>, vector<1x3x512xf32>
    %14 = vector.shape_cast %13 : vector<1x3x512xf32> to vector<3x512xf32>
    %15 = vector.shape_cast %12 : vector<3x512xf32> to vector<1x3x512xf32>
    tpu.vector_store %arg4[%c0_8, %c0_9, %c0_10], %15 {strides = array<i32>} : memref<1x3x512xf32, #tpu.memory_space<vmem>>, vector<1x3x512xf32>,
    return
  }
  func.func @transform_0(%arg0: i32) -> (i32, i32, i32) {
    %c0_i32 = arith.constant 0 : i32
    %c0_i32_0 = arith.constant 0 : i32
    %c0_i32_1 = arith.constant 0 : i32
    return %arg0, %c0_i32, %c0_i32_0 : i32, i32, i32
  }
  func.func @transform_1(%arg0: i32) -> (i32, i32, i32) {
    %c0_i32 = arith.constant 0 : i32
    %c0_i32_0 = arith.constant 0 : i32
    %c0_i32_1 = arith.constant 0 : i32
    return %arg0, %c0_i32, %c0_i32_0 : i32, i32, i32
  }
  func.func @transform_2(%arg0: i32) -> (i32, i32) {
    %c0_i32 = arith.constant 0 : i32
    %c0_i32_0 = arith.constant 0 : i32
    %c0_i32_1 = arith.constant 0 : i32
    return %c0_i32, %c0_i32_0 : i32, i32
  }
  func.func @transform_3(%arg0: i32) -> (i32, i32, i32) {
    %c0_i32 = arith.constant 0 : i32
    %c0_i32_0 = arith.constant 0 : i32
    %c0_i32_1 = arith.constant 0 : i32
    return %arg0, %c0_i32, %c0_i32_0 : i32, i32, i32
  }
}

</mosaic_0001>

<bundles_post_ra>
// kernel: conv_vsc_forward.11
= control target key start
LH: loop header
LB: loop body
LE: loop exit
PB: predicated region body
PF: predicated region fallthrough
CT: control target
= control target key end

     0   :  { %v244_v1 = vmov 0   ;;  %vm94_vm0 = vcmask 392192   ;;  %s313_s1 = inlined_call_operand.vmem [shape: bf16[48,512], index: 1, kind: input, shape index: {}]   ;;  %s314_s2 = inlined_call_operand.vmem [shape: f32[8,1], index: 2, kind: input, shape index: {}]   ;;  %s315_s0 = inlined_call_operand.vmem [shape: bf16[8,48], index: 0, kind: input, shape index: {}]   ;;  %s316_s3 = inlined_call_operand.vmem [shape: bf16[8,512], index: 3, kind: output, shape index: {}]  }
   0x1   :  { %v226_v0 = vld [vmem:[%s313_s1 + $0x44] ss:$16 sps:$4 sm:$0xff]   ;;  %130 = vmatprep.mubr.bf16.mxu0 %v244_v1  ;;  %171 = vmatprep.mubr.bf16.mxu1 %v244_v1  ;;  %v228_v2 = vld [vmem:[%s313_s1 + $0x4c] ss:$16 sps:$4 sm:$0xff]   ;;  %v230_v3 = vld [vmem:[%s313_s1 + $0x40] ss:$16 sps:$4 sm:$0xff]  }
   0x2   :  { %225 = vset.pattern.permute.xlu0 %v244_v1  ;;  %108 = vmatprep.subr.bf16.mxu0 %v226_v0  ;;  %v231_v4 = vld [vmem:[%s313_s1 + $0x48] ss:$16 sps:$4 sm:$0xff]   ;;  %v232_v5 = vld [vmem:[%s313_s1 + $0x24] ss:$16 sps:$4 sm:$0xff]   ;;  %v234_v6 = vld [vmem:[%s313_s1 + $0x2c] ss:$16 sps:$4 sm:$0xff]  }
   0x3   :  { %149 = vmatprep.subr.bf16.mxu1 %v228_v2  ;;  %109 = vmatpush1.bf16.msra.mxu0 %v230_v3  ;;  %v236_v7 = vld [vmem:[%s313_s1 + $0x20] ss:$16 sps:$4 sm:$0xff]   ;;  %v237_v8 = vld [vmem:[%s313_s1 + $0x28] ss:$16 sps:$4 sm:$0xff]   ;;  %v238_v9 = vld [vmem:[%s313_s1 + $0x4] ss:$16 sps:$4 sm:$0xff]  }
   0x4   :  { %150 = vmatpush1.bf16.msra.mxu1 %v231_v4  ;;  %110 = vmatprep.subr.bf16.mxu0 %v232_v5  ;;  %v240_v10 = vld [vmem:[%s313_s1 + $0xc] ss:$16 sps:$4 sm:$0xff]   ;;  %v242_v11 = vld [vmem:[%s313_s1] ss:$16 sps:$4 sm:$0xff]   ;;  %v243_v12 = vld [vmem:[%s313_s1 + $0x8] ss:$16 sps:$4 sm:$0xff]  }
   0x5   :  { %151 = vmatprep.subr.bf16.mxu1 %v234_v6  ;;  %v28_v13 = vld [vmem:[%s314_s2] sm:$0xff] }
   0x6   :  { %31 = vperm.xlu0 %225, %v28_v13   ;;  %v15_v14 = vld [vmem:[%s315_s0] sm:$0xf] }
   0x7   :  { %111 = vmatpush1.bf16.msra.mxu0 %v236_v7 }
   0x8   :  { %152 = vmatpush1.bf16.msra.mxu1 %v237_v8  ;;  %112 = vmatprep.subr.bf16.mxu0 %v238_v9 }
   0x9   :  { %153 = vmatprep.subr.bf16.mxu1 %v240_v10 }
   0xb   :  { %113 = vmatpush1.bf16.msra.mxu0 %v242_v11 }
   0xc   :  { %154 = vmatpush1.bf16.msra.mxu1 %v243_v12 }
   0xe   :  { %218 = vmatmul.mubr.msk.bf16.vlgmr.msra.gmra.mxu0 %vm94_vm0, %v15_v14 }
   0xf   :  { %219 = vmatmul.mubr.msk.bf16.vlgmr.msra.gmra.mxu1 %vm94_vm0, %v15_v14 }
  0x81   :  { %v32_v15 = vpop.permute.xlu0 %31 }
  0xce   :  { %v132_v16 = vpop.f32.mrf.mxu0 }
  0xcf   :  { %v173_v17 = vpop.f32.mrf.mxu1  ;;  %v133_v18 = vadd.f32 %v132_v16, %v32_v15 }
  0xd0   :  { %v174_v19 = vadd.f32 %v173_v17, %v32_v15  ;;  %v134_v20 = vpop.f32.mrf.mxu0 }
  0xd1   :  { %v175_v21 = vpop.f32.mrf.mxu1  ;;  %v135_v22 = vadd.f32 %v134_v20, %v32_v15  ;;  %v180_v26 = vmax.f32 %v133_v18, 0.0 }
  0xd2   :  { %v176_v23 = vadd.f32 %v175_v21, %v32_v15  ;;  %v136_v24 = vpop.f32.mrf.mxu0  ;;  %v182_v27 = vmax.f32 %v174_v19, 0.0 }
  0xd3   :  { %v177_v25 = vpop.f32.mrf.mxu1  ;;  %v181_v28 = vmax.f32 %v135_v22, 0.0 }
  0xd4   :  { %v183_v29 = vmax.f32 %v176_v23, 0.0  ;;  %v137_v30 = vpop.f32.mrf.mxu0 }
  0xd5   :  { %v178_v31 = vpop.f32.mrf.mxu1  ;;  %v222_v32 = vpack.c.bf16 %v181_v28, %v180_v26 }
  0xd6   :  { %v223_v33 = vpack.c.bf16 %v183_v29, %v182_v27 }
  0xd7   :  { %200 = vst [vmem:[%s316_s3] sm:$0xff] %v222_v32 }
  0xd8   :  { %201 = vst [vmem:[%s316_s3 + $0x8] sm:$0xff] %v223_v33 }

// kernel: conv_vsc_forward.12
= control target key start
LH: loop header
LB: loop body
LE: loop exit
PB: predicated region body
PF: predicated region fallthrough
CT: control target
= control target key end

     0   :  { %v182_v0 = vmov 0.0   ;;  %vm183_vm0 = vmmov 0   ;;  %v184_v2 = vmov 0   ;;  %s238_s1 = inlined_call_operand.vmem [shape: bf16[128,128], index: 1, kind: input, shape index: {}]   ;;  %s239_s2 = inlined_call_operand.vmem [shape: f32[8,1], index: 2, kind: input, shape index: {}]   ;;  %s240_s0 = inlined_call_operand.vmem [shape: bf16[8,128], index: 0, kind: input, shape index: {}]   ;;  %s241_s3 = inlined_call_operand.vmem [shape: bf16[8,128], index: 3, kind: output, shape index: {}]  }
   0x1   :  { %150 = vmatprep.subr.bf16.mxu0 %v182_v0  ;;  %v174_v1 = vld [vmem:[%s238_s1 + $0x38] sm:$0xff]   ;;  %166 = vmatprep.mubr.msk.bf16.mxu0 %vm183_vm0, %v182_v0  ;;  %v175_v3 = vld [vmem:[%s238_s1 + $0x30] sm:$0xff]   ;;  %v176_v4 = vld [vmem:[%s238_s1 + $0x28] sm:$0xff]  }
   0x2   :  { %173 = vset.pattern.permute.xlu0 %v184_v2  ;;  %151 = vmatpush3.bf16.msra.mxu0 %v174_v1  ;;  %v32_v5 = vld [vmem:[%s239_s2] sm:$0xff]  ;;  %v178_v7 = vld [vmem:[%s238_s1 + $0x18] sm:$0xff]   ;;  %v179_v8 = vld [vmem:[%s238_s1 + $0x10] sm:$0xff]  }
   0x3   :  { %152 = vmatprep.subr.bf16.mxu0 %v182_v0  ;;  %35 = vperm.xlu0 %173, %v32_v5   ;;  %v177_v6 = vld [vmem:[%s238_s1 + $0x20] sm:$0xff]   ;;  %v180_v9 = vld [vmem:[%s238_s1 + $0x8] sm:$0xff]  }
   0x4   :  { %v181_v10 = vld [vmem:[%s238_s1] sm:$0xff]  }
   0x5   :  { %v15_v11 = vld [vmem:[%s240_s0] sm:$0xf] }
   0x6   :  { %153 = vmatpush3.bf16.msra.mxu0 %v175_v3 }
   0x7   :  { %154 = vmatprep.subr.bf16.mxu0 %v182_v0 }
   0xa   :  { %155 = vmatpush3.bf16.msra.mxu0 %v176_v4 }
   0xb   :  { %156 = vmatprep.subr.bf16.mxu0 %v182_v0 }
   0xe   :  { %157 = vmatpush3.bf16.msra.mxu0 %v177_v6 }
   0xf   :  { %158 = vmatprep.subr.bf16.mxu0 %v182_v0 }
  0x12   :  { %159 = vmatpush3.bf16.msra.mxu0 %v178_v7 }
  0x13   :  { %160 = vmatprep.subr.bf16.mxu0 %v182_v0 }
  0x16   :  { %161 = vmatpush3.bf16.msra.mxu0 %v179_v8 }
  0x17   :  { %162 = vmatprep.subr.bf16.mxu0 %v182_v0 }
  0x1a   :  { %163 = vmatpush3.bf16.msra.mxu0 %v180_v9 }
  0x1b   :  { %164 = vmatprep.subr.bf16.mxu0 %v182_v0 }
  0x1e   :  { %165 = vmatpush3.bf16.msra.mxu0 %v181_v10 }
  0x21   :  { %167 = vmatmul.mubr.bf16.vlgmr.msra.gmra.mxu0 %v15_v11 }
  0x7e   :  { %v36_v12 = vpop.permute.xlu0 %35 }
  0xe1   :  { %v120_v13 = vpop.f32.mrf.mxu0 }
  0xe2   :  { %v121_v14 = vadd.f32 %v120_v13, %v36_v12 }
  0xe3   :  { %v168_v15 = vpop.f32.mrf.mxu0 }
  0xe4   :  { %v126_v16 = vmax.f32 %v121_v14, 0.0 }
  0xe5   :  { %v123_v17 = vpop.f32.mrf.mxu0 }
  0xe6   :  { %v127_v18 = vpack.c.bf16 %v126_v16, %v126_v16 }
  0xe7   :  { %v169_v19 = vpop.f32.mrf.mxu0 }
  0xe8   :  { %128 = vst [vmem:[%s241_s3] sm:$0xf] %v127_v18 }

// kernel: conv_vsc_forward.13
= control target key start
LH: loop header
LB: loop body
LE: loop exit
PB: predicated region body
PF: predicated region fallthrough
CT: control target
= control target key end

     0   :  { %v212_v0 = vmov 0.0   ;;  %vm213_vm0 = vmmov 0   ;;  %v214_v2 = vmov 0   ;;  %vm150_vm1 = vcmask 257024   ;;  %s274_s1 = inlined_call_operand.vmem [shape: bf16[128,32], index: 1, kind: input, shape index: {}]   ;;  %s275_s2 = inlined_call_operand.vmem [shape: f32[16,1], index: 2, kind: input, shape index: {}]   ;;  %s276_s0 = inlined_call_operand.vmem [shape: bf16[16,128], index: 0, kind: input, shape index: {}]   ;;  %s277_s3 = inlined_call_operand.vmem [shape: bf16[16,32], index: 3, kind: output, shape index: {}]  }
   0x1   :  { %179 = vmatprep.subr.bf16.mxu0 %v212_v0  ;;  %v203_v1 = vld [vmem:[%s274_s1 + $0x38] sm:$0xff]   ;;  %195 = vmatprep.mubr.msk.bf16.mxu0 %vm213_vm0, %v212_v0  ;;  %v204_v3 = vld [vmem:[%s274_s1 + $0x30] sm:$0xff]   ;;  %v205_v4 = vld [vmem:[%s274_s1 + $0x28] sm:$0xff]  }
   0x2   :  { %202 = vset.pattern.permute.xlu0 %v214_v2  ;;  %180 = vmatpush3.bf16.msra.mxu0 %v203_v1  ;;  %v33_v5 = vld [vmem:[%s275_s2] sm:$0xff]  ;;  %v34_v7 = vld [vmem:[%s275_s2 + $0x8] sm:$0xff]  ;;  %v207_v8 = vld [vmem:[%s274_s1 + $0x18] sm:$0xff]  }
   0x3   :  { %181 = vmatprep.subr.bf16.mxu0 %v212_v0  ;;  %v206_v6 = vld [vmem:[%s274_s1 + $0x20] sm:$0xff]   ;;  %37 = vperm.xlu0 %202, %v33_v5   ;;  %v208_v9 = vld [vmem:[%s274_s1 + $0x10] sm:$0xff]   ;;  %v209_v10 = vld [vmem:[%s274_s1 + $0x8] sm:$0xff]  }
   0x4   :  { %v210_v11 = vld [vmem:[%s274_s1] sm:$0xff]  }
   0x5   :  { %v211_v12 = vld [vmem:[%s276_s0] sm:$0xff]  }
   0x6   :  { %182 = vmatpush3.bf16.msra.mxu0 %v204_v3 }
   0x7   :  { %183 = vmatprep.subr.bf16.mxu0 %v212_v0  ;;  %42 = vperm.xlu0 %202, %v34_v7  }
   0xa   :  { %184 = vmatpush3.bf16.msra.mxu0 %v205_v4 }
   0xb   :  { %185 = vmatprep.subr.bf16.mxu0 %v212_v0 }
   0xe   :  { %186 = vmatpush3.bf16.msra.mxu0 %v206_v6 }
   0xf   :  { %187 = vmatprep.subr.bf16.mxu0 %v212_v0 }
  0x12   :  { %188 = vmatpush3.bf16.msra.mxu0 %v207_v8 }
  0x13   :  { %189 = vmatprep.subr.bf16.mxu0 %v212_v0 }
  0x16   :  { %190 = vmatpush3.bf16.msra.mxu0 %v208_v9 }
  0x17   :  { %191 = vmatprep.subr.bf16.mxu0 %v212_v0 }
  0x1a   :  { %192 = vmatpush3.bf16.msra.mxu0 %v209_v10 }
  0x1b   :  { %193 = vmatprep.subr.bf16.mxu0 %v212_v0 }
  0x1e   :  { %194 = vmatpush3.bf16.msra.mxu0 %v210_v11 }
  0x21   :  { %196 = vmatmul.mubr.bf16.vlgmr.msra.gmra.mxu0 %v211_v12 }
  0x7e   :  { %v38_v13 = vpop.permute.xlu0 %37 }
  0x82   :  { %v43_v18 = vpop.permute.xlu0 %42 }
  0xe1   :  { %v133_v14 = vpop.f32.mrf.mxu0 }
  0xe2   :  { %v134_v15 = vadd.f32 %v133_v14, %v38_v13 }
  0xe3   :  { %v197_v16 = vpop.f32.mrf.mxu0 }
  0xe4   :  { %v140_v17 = vmax.f32 %v134_v15, 0.0 }
  0xe5   :  { %v136_v19 = vpop.f32.mrf.mxu0 }
  0xe6   :  { %v168_v20 = vpack.c.bf16 %v140_v17, %v140_v17  ;;  %v137_v21 = vadd.f32 %v136_v19, %v43_v18 }
  0xe7   :  { %v198_v22 = vpop.f32.mrf.mxu0 }
  0xe8   :  { %151 = vst.msk [vmem:[%s277_s3] sm:$0xf] %vm150_vm1, %v168_v20  ;;  %v141_v23 = vmax.f32 %v137_v21, 0.0 }
  0xea   :  { %v169_v24 = vpack.c.bf16 %v141_v23, %v141_v23 }
  0xec   :  { %152 = vst.msk [vmem:[%s277_s3 + $0x4] sm:$0xf] %vm150_vm1, %v169_v24 }

// kernel: conv_vsc_forward.14
= control target key start
LH: loop header
LB: loop body
LE: loop exit
PB: predicated region body
PF: predicated region fallthrough
CT: control target
= control target key end

     0   :  { %v278_v1 = vmov 0   ;;  %vm210_vm0 = vcmask 64512   ;;  %s365_s1 = inlined_call_operand.vmem [shape: bf16[256,8], index: 1, kind: input, shape index: {}]   ;;  %s366_s0 = inlined_call_operand.vmem [shape: bf16[16,256], index: 0, kind: input, shape index: {}]   ;;  %s367_s2 = inlined_call_operand.vmem [shape: f32[16,1], index: 2, kind: input, shape index: {}]   ;;  %s368_s3 = inlined_call_operand.vmem [shape: f32[16,8], index: 3, kind: output, shape index: {}]  }
   0x1   :  { %v259_v0 = vld [vmem:[%s365_s1 + $0x78] sm:$0xff]   ;;  %258 = vset.pattern.permute.xlu0 %v278_v1  ;;  %v261_v3 = vld [vmem:[%s365_s1 + $0x70] sm:$0xff]   ;;  %v263_v5 = vld [vmem:[%s365_s1 + $0x68] sm:$0xff]  }
   0x2   :  { %v260_v2 = vld [vmem:[%s365_s1 + $0x38] sm:$0xff]   ;;  %235 = vmatprep.subr.bf16.mxu0 %v259_v0  ;;  %v262_v4 = vld [vmem:[%s365_s1 + $0x30] sm:$0xff]   ;;  %v264_v6 = vld [vmem:[%s365_s1 + $0x28] sm:$0xff]  }
   0x3   :  { %236 = vmatpush3.bf16.msra.mxu0 %v260_v2  ;;  %v265_v7 = vld [vmem:[%s365_s1 + $0x60] sm:$0xff]   ;;  %v267_v9 = vld [vmem:[%s365_s1 + $0x58] sm:$0xff]   ;;  %v269_v11 = vld [vmem:[%s365_s1 + $0x50] sm:$0xff]  }
   0x4   :  { %237 = vmatprep.subr.bf16.mxu0 %v261_v3  ;;  %v266_v8 = vld [vmem:[%s365_s1 + $0x20] sm:$0xff]   ;;  %v268_v10 = vld [vmem:[%s365_s1 + $0x18] sm:$0xff]   ;;  %v270_v14 = vld [vmem:[%s365_s1 + $0x10] sm:$0xff]  }
   0x5   :  { %v277_v12 = vld [vmem:[%s366_s0 + $0x4] ss:$8 sps:$4 sm:$0xff]   ;;  %v275_v20 = vld [vmem:[%s366_s0] ss:$8 sps:$4 sm:$0xff]  }
   0x6   :  { %v49_v13 = vld [vmem:[%s367_s2] sm:$0xff]  ;;  %199 = vmatprep.mubr.bf16.mxu0 %v277_v12  ;;  %v50_v15 = vld [vmem:[%s367_s2 + $0x8] sm:$0xff] }
   0x7   :  { %238 = vmatpush3.bf16.msra.mxu0 %v262_v4  ;;  %53 = vperm.xlu0 %258, %v49_v13   ;;  %v271_v16 = vld [vmem:[%s365_s1 + $0x48] sm:$0xff]   ;;  %v273_v18 = vld [vmem:[%s365_s1 + $0x40] sm:$0xff]  }
   0x8   :  { %239 = vmatprep.subr.bf16.mxu0 %v263_v5  ;;  %v272_v17 = vld [vmem:[%s365_s1 + $0x8] sm:$0xff]   ;;  %v274_v19 = vld [vmem:[%s365_s1] sm:$0xff]  }
   0xb   :  { %240 = vmatpush3.bf16.msra.mxu0 %v264_v6  ;;  %58 = vperm.xlu0 %258, %v50_v15  }
   0xc   :  { %241 = vmatprep.subr.bf16.mxu0 %v265_v7 }
   0xf   :  { %242 = vmatpush3.bf16.msra.mxu0 %v266_v8 }
  0x10   :  { %243 = vmatprep.subr.bf16.mxu0 %v267_v9 }
  0x13   :  { %244 = vmatpush3.bf16.msra.mxu0 %v268_v10 }
  0x14   :  { %245 = vmatprep.subr.bf16.mxu0 %v269_v11 }
  0x17   :  { %246 = vmatpush3.bf16.msra.mxu0 %v270_v14 }
  0x18   :  { %247 = vmatprep.subr.bf16.mxu0 %v271_v16 }
  0x1b   :  { %248 = vmatpush3.bf16.msra.mxu0 %v272_v17 }
  0x1c   :  { %249 = vmatprep.subr.bf16.mxu0 %v273_v18 }
  0x1f   :  { %250 = vmatpush3.bf16.msra.mxu0 %v274_v19 }
  0x22   :  { %200 = vmatmul.mubr.bf16.vlgmr.msra.gmra.mxu0 %v275_v20 }
  0x82   :  { %v54_v22 = vpop.permute.xlu0 %53 }
  0x86   :  { %v59_v30 = vpop.permute.xlu0 %58 }
  0xe2   :  { %v251_v21 = vpop.f32.mrf.mxu0 }
  0xe4   :  { %v252_v23 = vpop.f32.mrf.mxu0 }
  0xe5   :  { %v253_v24 = vadd.f32 %v252_v23, %v251_v21 }
  0xe6   :  { %v254_v25 = vpop.f32.mrf.mxu0 }
  0xe7   :  { %v202_v26 = vadd.f32 %v253_v24, %v54_v22 }
  0xe8   :  { %v255_v27 = vpop.f32.mrf.mxu0 }
  0xe9   :  { %v208_v28 = vmax.f32 %v202_v26, 0.0  ;;  %v256_v29 = vadd.f32 %v255_v27, %v254_v25 }
  0xeb   :  { %211 = vst.msk [vmem:[%s368_s3] sm:$0xff] %vm210_vm0, %v208_v28  ;;  %v205_v31 = vadd.f32 %v256_v29, %v59_v30 }
  0xed   :  { %v209_v32 = vmax.f32 %v205_v31, 0.0 }
  0xef   :  { %212 = vst.msk [vmem:[%s368_s3 + $0x8] sm:$0xff] %vm210_vm0, %v209_v32 }

// kernel: conv_vsc_forward.15
= control target key start
LH: loop header
LB: loop body
LE: loop exit
PB: predicated region body
PF: predicated region fallthrough
CT: control target
= control target key end

     0   :  { %s1078_s0 = inlined_call_operand.vmem [shape: f32[2,64], index: 0, kind: input, shape index: {}]   ;;  %s1079_s1 = inlined_call_operand.vmem [shape: f32[64,32], index: 1, kind: input, shape index: {}]   ;;  %s1080_s2 = inlined_call_operand.vmem [shape: f32[1,32], index: 2, kind: input, shape index: {}]   ;;  %s1081_s3 = inlined_call_operand.vmem [shape: f32[32,8], index: 3, kind: input, shape index: {}]   ;;  %s1082_s4 = inlined_call_operand.vmem [shape: f32[1,8], index: 4, kind: input, shape index: {}]   ;;  %s1083_s5 = inlined_call_operand.vmem [shape: f32[32,8], index: 5, kind: input, shape index: {}]   ;;  %s1084_s6 = inlined_call_operand.vmem [shape: f32[1,8], index: 6, kind: input, shape index: {}]   ;;  %s1085_s7 = inlined_call_operand.vmem [shape: f32[32,8], index: 7, kind: input, shape index: {}]   ;;  %s1086_s8 = inlined_call_operand.vmem [shape: f32[1,8], index: 8, kind: input, shape index: {}]   ;;  %s1087_s9 = inlined_call_operand.vmem [shape: f32[8,32], index: 9, kind: input, shape index: {}]   ;;  %s1088_s10 = inlined_call_operand.vmem [shape: f32[1,32], index: 10, kind: input, shape index: {}]   ;;  %s1089_s11 = inlined_call_operand.vmem [shape: f32[32,64], index: 11, kind: input, shape index: {}]   ;;  %s1090_s12 = inlined_call_operand.vmem [shape: f32[1,64], index: 12, kind: input, shape index: {}]   ;;  %s1091_s13 = inlined_call_operand.vmem [shape: f32[2,8], index: 13, kind: input, shape index: {}]   ;;  %s1092_s14 = inlined_call_operand.vmem [shape: f32[2,8], index: 14, kind: input, shape index: {}]   ;;  %s1093_s15 = inlined_call_operand.vmem [shape: f32[2,64], index: 15, kind: output, shape index: {0}]   ;;  %s1094_s16 = inlined_call_operand.hbm [shape: f32[2,8], index: 16, kind: output, shape index: {1}]   ;;  %s1095_s17 = inlined_call_operand.hbm [shape: f32[2,8], index: 17, kind: output, shape index: {2}]   ;;  %s1096_s18 = inlined_call_operand.hbm [shape: f32[2,8], index: 18, kind: output, shape index: {3}]  }
   0x1   :  { %1098 = sst [smem:[#allocation9_spill]] %s1078_s0 }
   0x2   :  { %1099 = sst [smem:[#allocation10_spill]] %s1079_s1 }
   0x3   :  { %1100 = sst [smem:[#allocation11_spill]] %s1080_s2 }
   0x4   :  { %24 = vsyncpa [#allocation3], 0  ;;  %s1101_s29 = sld [smem:[#allocation10_spill]]  ;;  %v823_v1 = vmov 0.0   ;;  %vm824_vm0 = vmmov 0   ;;  %v150_v4 = vld [vmem:[%s1081_s3 + $0x18] sm:$0xff] }
   0x5   :  { %678 = vmatprep.subr.mxu0 %v823_v1  ;;  %694 = vmatprep.mubr.msk.f32.mxu0 %vm824_vm0, %v823_v1  ;;  %v149_v5 = vld [vmem:[%s1081_s3 + $0x10] sm:$0xff] }
   0x6   :  { %697 = vmatprep.subr.mxu1 %v823_v1  ;;  %705 = vmatprep.mubr.msk.f32.mxu1 %vm824_vm0, %v823_v1 }
   0x7   :  { %698 = vmatpush3.msra.mxu1 %v150_v4 }
   0xa   :  { %v64_v0 = vld [vmem:[%s1101_s29 + $0x38] sm:$0xff]  ;;  %v63_v2 = vld [vmem:[%s1101_s29 + $0x30] sm:$0xff]  ;;  %v62_v3 = vld [vmem:[%s1101_s29 + $0x28] sm:$0xff] }
   0xb   :  { %679 = vmatpush3.msra.mxu0 %v64_v0 }
   0xc   :  { %680 = vmatprep.subr.mxu0 %v823_v1 }
   0xd   :  { %681 = vmatpush3.msra.mxu0 %v63_v2 }
   0xe   :  { %25 = vsyncpa [#allocation5], 0  ;;  %682 = vmatprep.subr.mxu0 %v823_v1  ;;  %v61_v6 = vld [vmem:[%s1101_s29 + $0x20] sm:$0xff]  ;;  %699 = vmatprep.subr.mxu1 %v823_v1  ;;  %v60_v7 = vld [vmem:[%s1101_s29 + $0x18] sm:$0xff]  ;;  %s1102_s22 = sld [smem:[#allocation9_spill]]  ;;  %vm72_vm1 = vcmask 523264  }
   0xf   :  { %683 = vmatpush3.msra.mxu0 %v62_v3  ;;  %700 = vmatpush3.msra.mxu1 %v149_v5  ;;  %v59_v8 = vld [vmem:[%s1101_s29 + $0x10] sm:$0xff]  ;;  %v58_v9 = vld [vmem:[%s1101_s29 + $0x8] sm:$0xff]  ;;  %v57_v10 = vld [vmem:[%s1101_s29] sm:$0xff]  ;;  %vm158_vm2 = vcmask 261120   ;;  %vm584_vm3 = vcmask 58368   ;;  %vm422_vm4 = vcmask 64512  }
  0x10   :  { %684 = vmatprep.subr.mxu0 %v823_v1  ;;  %701 = vmatprep.subr.mxu1 %v823_v1  ;;  %v316_v12 = vld [vmem:[%s1085_s7 + $0x18] sm:$0xff]  ;;  %v315_v13 = vld [vmem:[%s1085_s7 + $0x10] sm:$0xff]  ;;  %v148_v14 = vld [vmem:[%s1081_s3 + $0x8] sm:$0xff]  ;;  %s825_s25 = smov [#allocation4]   ;;  %s826_s27 = smov [#allocation2]  }
  0x11   :  { %685 = vmatpush3.msra.mxu0 %v61_v6  ;;  %702 = vmatpush3.msra.mxu1 %v148_v14  ;;  %v314_v15 = vld [vmem:[%s1085_s7 + $0x8] sm:$0xff]  ;;  %v147_v16 = vld [vmem:[%s1081_s3] sm:$0xff]  ;;  %v235_v23 = vld [vmem:[%s1083_s5 + $0x18] sm:$0xff]  ;;  %s606_s26 = sshll.u32 %s825_s25, 4  ;;  %s596_s28 = sshll.u32 %s826_s27, 4  ;;  %s607_s26 = int_to_ptr.vmem [resolvable:$true] %s606_s26  ;;  %s597_s28 = int_to_ptr.vmem [resolvable:$true] %s596_s28 }
  0x12   :  { %686 = vmatprep.subr.mxu0 %v823_v1  ;;  %703 = vmatprep.subr.mxu1 %v823_v1  ;;  %v313_v17 = vld [vmem:[%s1085_s7] sm:$0xff]  ;;  %v234_v24 = vld [vmem:[%s1083_s5 + $0x10] sm:$0xff]  ;;  %v233_v25 = vld [vmem:[%s1083_s5 + $0x8] sm:$0xff]  ;;  %s759_s30 = scalar_lea.vmem %s607_s26, 32  ;;  %p764_p1 = scmp.lt.s32.totalorder %s607_s26, %s607_s26 }
  0x13   :  { %687 = vmatpush3.msra.mxu0 %v60_v7  ;;  %704 = vmatpush3.msra.mxu1 %v147_v16  ;;  %v232_v26 = vld [vmem:[%s1083_s5] sm:$0xff]  ;;  %v500_v58 = vld [vmem:[%s1089_s11 + $0x18] sm:$0xff]  ;;  %v499_v59 = vld [vmem:[%s1089_s11 + $0x10] sm:$0xff]  ;;  %p760_p0 = scmp.ne.s32.totalorder %s607_s26, %s759_s30  ;;  %p765_p2 = scmp.lt.s32.totalorder %s759_s30, %s759_s30 }
  0x14   :  { %688 = vmatprep.subr.mxu0 %v823_v1  ;;  %v56_v11 = vld [vmem:[%s1102_s22] sm:$0x3]  ;;  %708 = vmatprep.subr.mxu1 %v823_v1  ;;  %s1103_s22 = sld [smem:[#allocation11_spill]]  ;;  %v498_v60 = vld [vmem:[%s1089_s11 + $0x8] sm:$0xff] }
  0x15   :  { %689 = vmatpush3.msra.mxu0 %v59_v8  ;;  %v414_v27 = vld [vmem:[%s1087_s9] sm:$0xff]  ;;  %p766_p3 = por %p765_p2, %p764_p1 }
  0x16   :  { %690 = vmatprep.subr.mxu0 %v823_v1  ;;  %v635_v28 = vld [vmem:[%s1082_s4] ss:$0 sm:$0xff] }
  0x17   :  { %691 = vmatpush3.msra.mxu0 %v58_v9  ;;  %v639_v29 = vld [vmem:[%s1086_s8] ss:$0 sm:$0xff]  ;;  %p767_p4 = pnand %p766_p3, %p760_p0 }
  0x18   :  { %692 = vmatprep.subr.mxu0 %v823_v1  ;;  %v637_v38 = vld [vmem:[%s1084_s6] ss:$0 sm:$0xff] }
  0x19   :  { %693 = vmatpush3.msra.mxu0 %v57_v10  ;;  %v401_v42 = vld [vmem:[%s1092_s14] sm:$0x3] }
  0x1a   :  { %695 = vmatmul.mubr.msk.f32.vlgmr.msra.gmra.mxu0 %vm72_vm1, %v56_v11  ;;  %719 = vmatprep.subr.mxu0 %v823_v1  ;;  %v633_v18 = vld [vmem:[%s1103_s22] ss:$0 sm:$0xff] }
  0x1b   :  { %720 = vmatpush3.msra.mxu0 %v316_v12  ;;  %727 = vmatprep.mubr.msk.f32.mxu0 %vm824_vm0, %v823_v1  ;;  %v398_v53 = vld [vmem:[%s1091_s13] sm:$0x3] }
  0x1c   :  { %721 = vmatprep.subr.mxu0 %v823_v1  ;;  %v497_v61 = vld [vmem:[%s1089_s11] sm:$0xff] }
  0x1d   :  { %722 = vmatpush3.msra.mxu0 %v315_v13  ;;  %v643_v62 = vld [vmem:[%s1088_s10] ss:$0 sm:$0xff] }
  0x1e   :  { %723 = vmatprep.subr.mxu0 %v823_v1 }
  0x1f   :  { %724 = vmatpush3.msra.mxu0 %v314_v15 }
  0x20   :  { %725 = vmatprep.subr.mxu0 %v823_v1 }
  0x21   :  { %726 = vmatpush3.msra.mxu0 %v313_v17 }
  0xda   :  { %v142_v19 = vpop.f32.mrf.mxu0 }
  0xdb   :  { %v143_v20 = vadd.f32 %v633_v18, %v142_v19 }
  0xdc   :  { %v696_v21 = vpop.f32.mrf.mxu0 }
  0xdd   :  { %v146_v22 = vmax.f32 %v143_v20, 0.0 }
  0xdf   :  { %706 = vmatmul.mubr.msk.f32.vlgmr.msra.gmra.mxu1 %vm158_vm2, %v146_v22  ;;  %728 = vmatmul.mubr.msk.f32.vlgmr.msra.gmra.mxu0 %vm158_vm2, %v146_v22 }
  0xe0   :  { %709 = vmatpush3.msra.mxu1 %v235_v23  ;;  %716 = vmatprep.mubr.msk.f32.mxu1 %vm824_vm0, %v823_v1 }
  0xe1   :  { %710 = vmatprep.subr.mxu1 %v823_v1 }
  0xe2   :  { %711 = vmatpush3.msra.mxu1 %v234_v24 }
  0xe3   :  { %712 = vmatprep.subr.mxu1 %v823_v1 }
  0xe4   :  { %713 = vmatpush3.msra.mxu1 %v233_v25 }
  0xe5   :  { %714 = vmatprep.subr.mxu1 %v823_v1 }
  0xe6   :  { %715 = vmatpush3.msra.mxu1 %v232_v26 }
  0xe7   :  { %717 = vmatmul.mubr.msk.f32.vlgmr.msra.gmra.mxu1 %vm158_vm2, %v146_v22  ;;  %730 = vmatprep.subr.mxu1 %v823_v1 }
  0xe8   :  { %732 = vmatprep.mubr.msk.f32.mxu1 %vm824_vm0, %v823_v1  ;;  %731 = vmatpush3.msra.mxu1 %v414_v27 }
  0xe9   :  { %735 = vmatprep.subr.mxu1 %v823_v1 }
 0x19f   :  { %v228_v30 = vpop.f32.mrf.mxu1  ;;  %v390_v31 = vpop.f32.mrf.mxu0 }
 0x1a0   :  { %v229_v32 = vadd.f32 %v635_v28, %v228_v30  ;;  %v391_v33 = vadd.f32 %v639_v29, %v390_v31 }
 0x1a1   :  { %v707_v34 = vpop.f32.mrf.mxu1  ;;  %v729_v35 = vpop.f32.mrf.mxu0 }
 0x1a2   :  { %v394_v36 = vmin.f32 %v391_v33, 0.0  ;;  %585 = vst.msk [vmem:[#allocation2] sm:$0x3] %vm584_vm3, %v229_v32 }
 0x1a4   :  { %v402_v37 = vmul.f32 1.442695, %v394_v36  ;;  %587 = vst.msk [vmem:[#allocation6] sm:$0x3] %vm584_vm3, %v394_v36 }
 0x1a6   :  { %751 = vpow2.f32 %v402_v37 }
 0x1a7   :  { %v309_v39 = vpop.f32.mrf.mxu1 }
 0x1a8   :  { %v310_v40 = vadd.f32 %v637_v38, %v309_v39 }
 0x1a9   :  { %v718_v41 = vpop.f32.mrf.mxu1 }
 0x1aa   :  { %586 = vst.msk [vmem:[#allocation4] sm:$0x3] %vm584_vm3, %v310_v40  ;;  %v395_v48 = vmul.f32 0.5, %v310_v40 }
 0x1ac   :  { %v396_v49 = vmul.f32 1.442695, %v395_v48 }
 0x1b3   :  { %v752_v43 = vpop.eup %751 }
 0x1b4   :  { %v404_v44 = vadd.f32 %v752_v43, %v401_v42 }
 0x1b6   :  { %v641_v45 = vadd.f32 -1.0, %v404_v44 }
 0x1b8   :  { %v642_v46 = vmul.f32 -50.0, %v641_v45 }
 0x1ba   :  { %v408_v47 = vmul.f32 1.442695, %v642_v46 }
 0x1bc   :  { %753 = vpow2.f32 %v408_v47 }
 0x1bd   :  { %755 = vpow2.f32 %v396_v49 }
 0x1c9   :  { %v754_v50 = vpop.eup %753 }
 0x1ca   :  { %v410_v51 = vadd.f32 1.0, %v754_v50  ;;  %v756_v52 = vpop.eup %755 }
 0x1cb   :  { %v399_v54 = vmul.f32 %v756_v52, %v398_v53 }
 0x1cc   :  { %757 = vrcp.f32 %v410_v51 }
 0x1cd   :  { %v400_v55 = vadd.f32 %v399_v54, %v229_v32 }
 0x1d9   :  { %v758_v56 = vpop.eup %757 }
 0x1da   :  { %v413_v57 = vmul.f32 %v758_v56, %v400_v55 }
 0x1dc   :  { %733 = vmatmul.mubr.msk.f32.vlgmr.msra.gmra.mxu1 %vm422_vm4, %v413_v57 }
 0x1dd   :  { %736 = vmatpush3.msra.mxu1 %v500_v58  ;;  %743 = vmatprep.mubr.msk.f32.mxu1 %vm824_vm0, %v823_v1 }
 0x1de   :  { %737 = vmatprep.subr.mxu1 %v823_v1 }
 0x1df   :  { %738 = vmatpush3.msra.mxu1 %v499_v59 }
 0x1e0   :  { %739 = vmatprep.subr.mxu1 %v823_v1 }
 0x1e1   :  { %740 = vmatpush3.msra.mxu1 %v498_v60 }
 0x1e2   :  { %741 = vmatprep.subr.mxu1 %v823_v1 }
 0x1e3   :  { %742 = vmatpush3.msra.mxu1 %v497_v61 }
 0x29c   :  { %v492_v63 = vpop.f32.mrf.mxu1 }
 0x29d   :  { %v493_v0 = vadd.f32 %v643_v62, %v492_v63 }
 0x29e   :  { %v734_v2 = vpop.f32.mrf.mxu1 }
 0x29f   :  { %v496_v3 = vmax.f32 %v493_v0, 0.0 }
 0x2a1   :  { %744 = vmatmul.mubr.msk.f32.vlgmr.msra.gmra.mxu1 %vm158_vm2, %v496_v3 }
 0x2a2   :  { %770 = shalt.err (!%p767_p4)
}
 0x2a3   :  { %609 = dma.vmem_to_hbm [thread:$0]  %s607_s26, 32, %s1095_s17, [#allocation5]  }
 0x2a4   :  { %s779_s5 = scalar_lea.vmem %s597_s28, 32  ;;  %p784_p6 = scmp.lt.s32.totalorder %s597_s28, %s597_s28 }
 0x2a5   :  { %p780_p5 = scmp.ne.s32.totalorder %s597_s28, %s779_s5  ;;  %p785_p7 = scmp.lt.s32.totalorder %s779_s5, %s779_s5 }
 0x2a7   :  { %p786_p8 = por %p785_p7, %p784_p6 }
 0x2a9   :  { %p787_p9 = pnand %p786_p8, %p780_p5 }
 0x2ab   :  { %790 = shalt.err (!%p787_p9)
}
 0x2ac   :  { %599 = dma.vmem_to_hbm [thread:$0]  %s597_s28, 32, %s1094_s16, [#allocation3]  }
 0x2ad   :  { %s827_s9 = smov [#allocation6]  }
 0x2ae   :  { %s616_s1 = sshll.u32 %s827_s9, 4  ;;  %s617_s1 = int_to_ptr.vmem [resolvable:$true] %s616_s1 }
 0x2af   :  { %s799_s4 = scalar_lea.vmem %s617_s1, 32  ;;  %p804_p11 = scmp.lt.s32.totalorder %s617_s1, %s617_s1 }
 0x2b0   :  { %p800_p10 = scmp.ne.s32.totalorder %s617_s1, %s799_s4  ;;  %p805_p12 = scmp.lt.s32.totalorder %s799_s4, %s799_s4 }
 0x2b2   :  { %p806_p13 = por %p805_p12, %p804_p11 }
 0x2b4   :  { %p807_p0 = pnand %p806_p13, %p800_p10 }
 0x2b6   :  { %810 = shalt.err (!%p807_p0)
}
 0x2b7   :  { %619 = dma.vmem_to_hbm [thread:$0]  %s617_s1, 32, %s1096_s18, [#allocation5]   ;;  %v645_v1 = vld [vmem:[%s1090_s12] ss:$0 sm:$0xff]  ;;  %vm582_vm5 = vcmask 517120  }
 0x361   :  { %v577_v4 = vpop.f32.mrf.mxu1 }
 0x362   :  { %v578_v5 = vadd.f32 %v645_v1, %v577_v4 }
 0x363   :  { %v745_v6 = vpop.f32.mrf.mxu1 }
 0x364   :  { %v581_v7 = vmax.f32 %v578_v5, 0.0 }
 0x366   :  { %583 = vst.msk [vmem:[%s1093_s15] sm:$0x3] %vm582_vm5, %v581_v7 }
 0x367   :  { %819 = dma.done.wait [#allocation3], 32  }
 0x368   :  { %820 = vsyncadd [#allocation3], 4294967264 }
 0x369   :  { %821 = dma.done.wait [#allocation5], 64  }
 0x36a   :  { %822 = vsyncadd [#allocation5], 4294967232 }
 0x36b   :  { %631 = vsyncpa [#allocation3], 1 }
 0x36c   :  { %632 = vsyncpa [#allocation5], 1 }

// kernel: conv_vsc_forward.16
= control target key start
LH: loop header
LB: loop body
LE: loop exit
PB: predicated region body
PF: predicated region fallthrough
CT: control target
= control target key end

     0   :  { %s459_s12 = smov 0   ;;  %s489_s0 = inlined_call_operand.vmem [shape: bf16[4,16,64], index: 0, kind: input, shape index: {}]   ;;  %s490_s1 = inlined_call_operand.vmem [shape: bf16[4,64,8], index: 1, kind: input, shape index: {}]   ;;  %s491_s2 = inlined_call_operand.vmem [shape: f32[16,1], index: 2, kind: input, shape index: {}]   ;;  %s492_s3 = inlined_call_operand.vmem [shape: bf16[4,16,8], index: 3, kind: output, shape index: {}]  }
   0x1 LB: > { %s368_s13 = sadd.s32 4294967295, %s434_s12   ;;  %p372_p0 = scmp.ge.s32.totalorder %s434_s12, 1  ;;  %s434_s12 = sphi %s459_s12, %s13_s12  }
   0x2   : > { %p147_p1 = scmp.lt.s32.totalorder %s434_s12, 5 }
   0x4   : > { %p148_p2 = pnand %p372_p0, %p147_p1 }
   0x5   : > { %p176_p3 = scmp.lt.s32.totalorder (!%p148_p2), %s368_s13, 3 }
   0x6   : > { %151 = sbr.rel (%p148_p2) target bundleno = 234 (0xea), region = 32 }
   0xb   : > { %v202_v0 = vld [vmem:[%s491_s2] sm:$0xff]  ;;  %v436_v1 = vmov 0.0   ;;  %vm437_vm0 = vmmov 0   ;;  %s494_s13 = smov (!%p176_p3, %s368_s13), 3  ;;  %v438_v2 = vmov 0   ;;  %v203_v3 = vld [vmem:[%s491_s2 + $0x8] sm:$0xff] }
   0xc   : > { %399 = vmatprep.subr.bf16.mxu0 %v436_v1  ;;  %407 = vmatprep.mubr.msk.bf16.mxu0 %vm437_vm0, %v436_v1  ;;  %s390_s16 = sshll.u32 %s494_s13, 5  ;;  %s389_s22 = sshll.u32 %s494_s13, 3  ;;  %vm243_vm1 = vcmask 523264   ;;  %vm298_vm2 = vcmask 60416  }
   0xd   : > { %422 = vset.pattern.permute.xlu0 %v438_v2  ;;  %s185_s21 = scalar_lea.vmem %s490_s1, %s390_s16  ;;  %s180_s25 = scalar_lea.vmem %s489_s0, %s389_s22 }
   0xe   : > { %206 = vperm.xlu0 %422, %v202_v0   ;;  %v423_v4 = vld [vmem:[%s185_s21 + $0x18] sm:$0xff]   ;;  %v424_v5 = vld [vmem:[%s185_s21 + $0x10] sm:$0xff]   ;;  %v425_v6 = vld [vmem:[%s185_s21 + $0x8] sm:$0xff]   ;;  %s190_s28 = scalar_lea.vmem %s492_s3, %s389_s22 }
   0xf   : > { %400 = vmatpush3.bf16.msra.mxu0 %v423_v4  ;;  %v426_v7 = vld [vmem:[%s185_s21] sm:$0xff]  }
  0x10   : > { %401 = vmatprep.subr.bf16.mxu0 %v436_v1  ;;  %v427_v8 = vld [vmem:[%s180_s25] sm:$0xff]  }
  0x12   : > { %211 = vperm.xlu0 %422, %v203_v3  }
  0x13   : > { %402 = vmatpush3.bf16.msra.mxu0 %v424_v5 }
  0x14   : > { %403 = vmatprep.subr.bf16.mxu0 %v436_v1 }
  0x17   : > { %404 = vmatpush3.bf16.msra.mxu0 %v425_v6 }
  0x18   : > { %405 = vmatprep.subr.bf16.mxu0 %v436_v1 }
  0x1b   : > { %406 = vmatpush3.bf16.msra.mxu0 %v426_v7 }
  0x1e   : > { %408 = vmatmul.mubr.msk.bf16.vlgmr.msra.gmra.mxu0 %vm243_vm1, %v427_v8 }
  0x89   : > { %v207_v9 = vpop.permute.xlu0 %206 }
  0x8d   : > { %v212_v14 = vpop.permute.xlu0 %211 }
  0xde   : > { %v281_v10 = vpop.f32.mrf.mxu0 }
  0xdf   : > { %v282_v11 = vadd.f32 %v281_v10, %v207_v9 }
  0xe0   : > { %v409_v12 = vpop.f32.mrf.mxu0 }
  0xe1   : > { %v288_v13 = vmax.f32 %v282_v11, 0.0 }
  0xe2   : > { %v284_v15 = vpop.f32.mrf.mxu0 }
  0xe3   : > { %v392_v16 = vpack.c.bf16 %v288_v13, %v288_v13  ;;  %v285_v17 = vadd.f32 %v284_v15, %v212_v14 }
  0xe4   : > { %v410_v18 = vpop.f32.mrf.mxu0 }
  0xe5   : > { %299 = vst.msk [vmem:[%s190_s28] sm:$0xf] %vm298_vm2, %v392_v16  ;;  %v289_v19 = vmax.f32 %v285_v17, 0.0 }
  0xe7   : > { %v393_v20 = vpack.c.bf16 %v289_v19, %v289_v19 }
  0xe9   : > { %300 = vst.msk [vmem:[%s190_s28 + $0x4] sm:$0xf] %vm298_vm2, %v393_v20 }
  0xea PF: > { %s13_s12 = sadd.s32 1, %s434_s12  }
  0xeb   : > { %p10_p4 = scmp.ge.s32.totalorder %s13_s12, 6  }
  0xed   :  { %12 = sbr.rel (!%p10_p4) target bundleno = 1 (0x1), region = 65 }

// kernel: conv_vsc_forward.17
= control target key start
LH: loop header
LB: loop body
LE: loop exit
PB: predicated region body
PF: predicated region fallthrough
CT: control target
= control target key end

     0   :  { %s420_s12 = smov 0   ;;  %s443_s0 = inlined_call_operand.vmem [shape: bf16[4,8,64], index: 0, kind: input, shape index: {}]   ;;  %s444_s1 = inlined_call_operand.vmem [shape: bf16[4,64,32], index: 1, kind: input, shape index: {}]   ;;  %s445_s2 = inlined_call_operand.vmem [shape: f32[8,1], index: 2, kind: input, shape index: {}]   ;;  %s446_s3 = inlined_call_operand.vmem [shape: bf16[4,8,32], index: 3, kind: output, shape index: {}]  }
   0x1 LB: > { %s339_s13 = sadd.s32 4294967295, %s395_s12   ;;  %p343_p0 = scmp.ge.s32.totalorder %s395_s12, 1  ;;  %s395_s12 = sphi %s420_s12, %s13_s12  }
   0x2   : > { %p146_p1 = scmp.lt.s32.totalorder %s395_s12, 5 }
   0x4   : > { %p147_p2 = pnand %p343_p0, %p146_p1 }
   0x5   : > { %p173_p3 = scmp.lt.s32.totalorder (!%p147_p2), %s339_s13, 3 }
   0x6   : > { %150 = sbr.rel (%p147_p2) target bundleno = 230 (0xe6), region = 32 }
   0xb   : > { %v196_v0 = vld [vmem:[%s445_s2] sm:$0xff]  ;;  %v397_v1 = vmov 0.0   ;;  %vm398_vm0 = vmmov 0   ;;  %s448_s13 = smov (!%p173_p3, %s339_s13), 3  ;;  %v399_v2 = vmov 0   ;;  %vm226_vm1 = vcmask 523264  }
   0xc   : > { %361 = vmatprep.subr.bf16.mxu0 %v397_v1  ;;  %369 = vmatprep.mubr.msk.bf16.mxu0 %vm398_vm0, %v397_v1  ;;  %s355_s16 = sshll.u32 %s448_s13, 5  ;;  %s344_s20 = sshll.u32 %s448_s13, 2  ;;  %vm272_vm2 = vcmask 257024  }
   0xd   : > { %384 = vset.pattern.permute.xlu0 %v399_v2  ;;  %s181_s19 = scalar_lea.vmem %s444_s1, %s355_s16  ;;  %s176_s23 = scalar_lea.vmem %s443_s0, %s344_s20 }
   0xe   : > { %199 = vperm.xlu0 %384, %v196_v0   ;;  %v385_v3 = vld [vmem:[%s181_s19 + $0x18] sm:$0xff]   ;;  %v386_v4 = vld [vmem:[%s181_s19 + $0x10] sm:$0xff]   ;;  %v387_v5 = vld [vmem:[%s181_s19 + $0x8] sm:$0xff]   ;;  %s185_s26 = scalar_lea.vmem %s446_s3, %s344_s20 }
   0xf   : > { %362 = vmatpush3.bf16.msra.mxu0 %v385_v3  ;;  %v388_v6 = vld [vmem:[%s181_s19] sm:$0xff]  }
  0x10   : > { %363 = vmatprep.subr.bf16.mxu0 %v397_v1  ;;  %v187_v7 = vld [vmem:[%s176_s23] sm:$0xf] }
  0x13   : > { %364 = vmatpush3.bf16.msra.mxu0 %v386_v4 }
  0x14   : > { %365 = vmatprep.subr.bf16.mxu0 %v397_v1 }
  0x17   : > { %366 = vmatpush3.bf16.msra.mxu0 %v387_v5 }
  0x18   : > { %367 = vmatprep.subr.bf16.mxu0 %v397_v1 }
  0x1b   : > { %368 = vmatpush3.bf16.msra.mxu0 %v388_v6 }
  0x1e   : > { %370 = vmatmul.mubr.msk.bf16.vlgmr.msra.gmra.mxu0 %vm226_vm1, %v187_v7 }
  0x89   : > { %v200_v8 = vpop.permute.xlu0 %199 }
  0xde   : > { %v264_v9 = vpop.f32.mrf.mxu0 }
  0xdf   : > { %v265_v10 = vadd.f32 %v264_v9, %v200_v8 }
  0xe0   : > { %v371_v11 = vpop.f32.mrf.mxu0 }
  0xe1   : > { %v270_v12 = vmax.f32 %v265_v10, 0.0 }
  0xe2   : > { %v267_v13 = vpop.f32.mrf.mxu0 }
  0xe3   : > { %v271_v14 = vpack.c.bf16 %v270_v12, %v270_v12 }
  0xe4   : > { %v372_v15 = vpop.f32.mrf.mxu0 }
  0xe5   : > { %273 = vst.msk [vmem:[%s185_s26] sm:$0xf] %vm272_vm2, %v271_v14 }
  0xe6 PF: > { %s13_s12 = sadd.s32 1, %s395_s12  }
  0xe7   : > { %p10_p4 = scmp.ge.s32.totalorder %s13_s12, 6  }
  0xe9   :  { %12 = sbr.rel (!%p10_p4) target bundleno = 1 (0x1), region = 65 }

// kernel: conv_vsc_forward.18
= control target key start
LH: loop header
LB: loop body
LE: loop exit
PB: predicated region body
PF: predicated region fallthrough
CT: control target
= control target key end

     0   :  { %s393_s12 = smov 0   ;;  %s416_s0 = inlined_call_operand.vmem [shape: bf16[4,8,32], index: 0, kind: input, shape index: {}]   ;;  %s417_s1 = inlined_call_operand.vmem [shape: bf16[4,32,128], index: 1, kind: input, shape index: {}]   ;;  %s418_s2 = inlined_call_operand.vmem [shape: f32[8,1], index: 2, kind: input, shape index: {}]   ;;  %s419_s3 = inlined_call_operand.vmem [shape: bf16[4,8,128], index: 3, kind: output, shape index: {}]  }
   0x1 LB: > { %s322_s13 = sadd.s32 4294967295, %s368_s12   ;;  %p326_p0 = scmp.ge.s32.totalorder %s368_s12, 1  ;;  %s368_s12 = sphi %s393_s12, %s13_s12  }
   0x2   : > { %p146_p1 = scmp.lt.s32.totalorder %s368_s12, 5 }
   0x4   : > { %p147_p2 = pnand %p326_p0, %p146_p1 }
   0x5   : > { %p173_p3 = scmp.lt.s32.totalorder (!%p147_p2), %s322_s13, 3 }
   0x6   : > { %150 = sbr.rel (%p147_p2) target bundleno = 222 (0xde), region = 32 }
   0xb   : > { %v192_v0 = vld [vmem:[%s418_s2] sm:$0xff]  ;;  %v370_v1 = vmov 0.0   ;;  %vm371_vm0 = vmmov 0   ;;  %s421_s13 = smov (!%p173_p3, %s322_s13), 3  ;;  %v372_v2 = vmov 0   ;;  %vm210_vm1 = vcmask 261120  }
   0xc   : > { %340 = vmatprep.subr.bf16.mxu0 %v370_v1  ;;  %344 = vmatprep.mubr.msk.bf16.mxu0 %vm371_vm0, %v370_v1  ;;  %s336_s16 = sshll.u32 %s421_s13, 4  ;;  %s327_s20 = sshll.u32 %s421_s13, 2 }
   0xd   : > { %359 = vset.pattern.permute.xlu0 %v372_v2  ;;  %s181_s19 = scalar_lea.vmem %s417_s1, %s336_s16  ;;  %s176_s23 = scalar_lea.vmem %s416_s0, %s327_s20 }
   0xe   : > { %195 = vperm.xlu0 %359, %v192_v0   ;;  %v360_v3 = vld [vmem:[%s181_s19 + $0x8] sm:$0xff]   ;;  %v361_v4 = vld [vmem:[%s181_s19] sm:$0xff]   ;;  %s185_s26 = scalar_lea.vmem %s419_s3, %s327_s20 }
   0xf   : > { %341 = vmatpush3.bf16.msra.mxu0 %v360_v3  ;;  %v187_v5 = vld [vmem:[%s176_s23] sm:$0xf] }
  0x10   : > { %342 = vmatprep.subr.bf16.mxu0 %v370_v1 }
  0x13   : > { %343 = vmatpush3.bf16.msra.mxu0 %v361_v4 }
  0x16   : > { %345 = vmatmul.mubr.msk.bf16.vlgmr.msra.gmra.mxu0 %vm210_vm1, %v187_v5 }
  0x89   : > { %v196_v6 = vpop.permute.xlu0 %195 }
  0xd6   : > { %v248_v7 = vpop.f32.mrf.mxu0 }
  0xd7   : > { %v249_v8 = vadd.f32 %v248_v7, %v196_v6 }
  0xd8   : > { %v346_v9 = vpop.f32.mrf.mxu0 }
  0xd9   : > { %v254_v10 = vmax.f32 %v249_v8, 0.0 }
  0xda   : > { %v251_v11 = vpop.f32.mrf.mxu0 }
  0xdb   : > { %v255_v12 = vpack.c.bf16 %v254_v10, %v254_v10 }
  0xdc   : > { %v347_v13 = vpop.f32.mrf.mxu0 }
  0xdd   : > { %256 = vst [vmem:[%s185_s26] sm:$0xf] %v255_v12 }
  0xde PF: > { %s13_s12 = sadd.s32 1, %s368_s12  }
  0xdf   : > { %p10_p4 = scmp.ge.s32.totalorder %s13_s12, 6  }
  0xe1   :  { %12 = sbr.rel (!%p10_p4) target bundleno = 1 (0x1), region = 65 }

// kernel: conv_vsc_forward.19
= control target key start
LH: loop header
LB: loop body
LE: loop exit
PB: predicated region body
PF: predicated region fallthrough
CT: control target
= control target key end

     0   :  { %s526_s12 = smov 0   ;;  %s554_s0 = inlined_call_operand.vmem [shape: bf16[4,3,32], index: 0, kind: input, shape index: {}]   ;;  %s555_s1 = inlined_call_operand.vmem [shape: bf16[4,32,512], index: 1, kind: input, shape index: {}]   ;;  %s556_s2 = inlined_call_operand.vmem [shape: f32[3,1], index: 2, kind: input, shape index: {}]   ;;  %s557_s3 = inlined_call_operand.vmem [shape: f32[4,3,512], index: 3, kind: output, shape index: {}]  }
   0x1 LB: > { %s431_s13 = sadd.s32 4294967295, %s503_s12   ;;  %p435_p0 = scmp.ge.s32.totalorder %s503_s12, 1  ;;  %s503_s12 = sphi %s526_s12, %s13_s12  }
   0x2   : > { %p146_p1 = scmp.lt.s32.totalorder %s503_s12, 5 }
   0x4   : > { %p147_p2 = pnand %p435_p0, %p146_p1 }
   0x5   : > { %p174_p3 = scmp.lt.s32.totalorder (!%p147_p2), %s431_s13, 3 }
   0x6   : > { %150 = sbr.rel (%p147_p2) target bundleno = 256 (0x100), region = 32 }
   0xb   : > { %v198_v0 = vld [vmem:[%s556_s2] sm:$0x7]  ;;  %v505_v1 = vmov 0   ;;  %s559_s13 = smov (!%p174_p3, %s431_s13), 3  ;;  %vm244_vm0 = vcmask 261120  }
   0xc   : > { %280 = vmatprep.mubr.bf16.mxu0 %v505_v1  ;;  %321 = vmatprep.mubr.bf16.mxu1 %v505_v1  ;;  %s457_s16 = sshll.u32 %s559_s13, 6  ;;  %s436_s20 = sshll.u32 %s559_s13, 1 }
   0xd   : > { %468 = vset.pattern.permute.xlu0 %v505_v1  ;;  %s182_s19 = scalar_lea.vmem %s555_s1, %s457_s16  ;;  %s177_s23 = scalar_lea.vmem %s554_s0, %s436_s20 }
   0xe   : > { %201 = vperm.xlu0 %468, %v198_v0   ;;  %v469_v2 = vld [vmem:[%s182_s19 + $0x24] ss:$16 sps:$4 sm:$0xff]   ;;  %v471_v3 = vld [vmem:[%s182_s19 + $0x2c] ss:$16 sps:$4 sm:$0xff]   ;;  %v473_v4 = vld [vmem:[%s182_s19 + $0x20] ss:$16 sps:$4 sm:$0xff]  }
   0xf   : > { %260 = vmatprep.subr.bf16.mxu0 %v469_v2  ;;  %v474_v5 = vld [vmem:[%s182_s19 + $0x28] ss:$16 sps:$4 sm:$0xff]   ;;  %301 = vmatprep.subr.bf16.mxu1 %v471_v3  ;;  %v475_v6 = vld [vmem:[%s182_s19 + $0x4] ss:$16 sps:$4 sm:$0xff]   ;;  %v477_v7 = vld [vmem:[%s182_s19 + $0xc] ss:$16 sps:$4 sm:$0xff]  }
  0x10   : > { %261 = vmatpush1.bf16.msra.mxu0 %v473_v4  ;;  %302 = vmatpush1.bf16.msra.mxu1 %v474_v5  ;;  %v479_v8 = vld [vmem:[%s182_s19] ss:$16 sps:$4 sm:$0xff]   ;;  %v480_v9 = vld [vmem:[%s182_s19 + $0x8] ss:$16 sps:$4 sm:$0xff]   ;;  %s458_s24 = sshll.u32 %s559_s13, 4 }
  0x11   : > { %262 = vmatprep.subr.bf16.mxu0 %v475_v6  ;;  %303 = vmatprep.subr.bf16.mxu1 %v477_v7  ;;  %v189_v10 = vld [vmem:[%s177_s23] sm:$0x3]  ;;  %s187_s27 = scalar_lea.vmem %s557_s3, %s458_s24 }
  0x14   : > { %263 = vmatpush1.bf16.msra.mxu0 %v479_v8  ;;  %304 = vmatpush1.bf16.msra.mxu1 %v480_v9 }
  0x17   : > { %449 = vmatmul.mubr.msk.bf16.vlgmr.msra.gmra.mxu0 %vm244_vm0, %v189_v10  ;;  %450 = vmatmul.mubr.msk.bf16.vlgmr.msra.gmra.mxu1 %vm244_vm0, %v189_v10 }
  0x89   : > { %v202_v11 = vpop.permute.xlu0 %201 }
  0xd7   : > { %v282_v12 = vpop.f32.mrf.mxu0  ;;  %v323_v13 = vpop.f32.mrf.mxu1 }
  0xd8   : > { %v283_v14 = vadd.f32 %v282_v12, %v202_v11  ;;  %v324_v15 = vadd.f32 %v323_v13, %v202_v11 }
  0xd9   : > { %v284_v16 = vpop.f32.mrf.mxu0  ;;  %v325_v17 = vpop.f32.mrf.mxu1 }
  0xda   : > { %v451_v18 = vmul.f32 -1.442695, %v283_v14  ;;  %v453_v19 = vmul.f32 -1.442695, %v324_v15  ;;  %v285_v20 = vadd.f32 %v284_v16, %v202_v11  ;;  %v326_v21 = vadd.f32 %v325_v17, %v202_v11 }
  0xdb   : > { %v286_v22 = vpop.f32.mrf.mxu0  ;;  %v327_v23 = vpop.f32.mrf.mxu1 }
  0xdc   : > { %481 = vpow2.f32 %v451_v18  ;;  %v452_v24 = vmul.f32 -1.442695, %v285_v20  ;;  %v454_v25 = vmul.f32 -1.442695, %v326_v21 }
  0xdd   : > { %483 = vpow2.f32 %v453_v19  ;;  %v287_v26 = vpop.f32.mrf.mxu0  ;;  %v328_v27 = vpop.f32.mrf.mxu1 }
  0xde   : > { %485 = vpow2.f32 %v452_v24 }
  0xdf   : > { %487 = vpow2.f32 %v454_v25 }
  0xe9   : > { %v482_v28 = vpop.eup %481 }
  0xea   : > { %v484_v29 = vpop.eup %483  ;;  %v342_v30 = vadd.f32 1.0, %v482_v28 }
  0xeb   : > { %v486_v31 = vpop.eup %485  ;;  %v344_v32 = vadd.f32 1.0, %v484_v29 }
  0xec   : > { %v488_v33 = vpop.eup %487  ;;  %489 = vrcp.f32 %v342_v30  ;;  %v343_v34 = vadd.f32 1.0, %v486_v31 }
  0xed   : > { %491 = vrcp.f32 %v344_v32  ;;  %v345_v35 = vadd.f32 1.0, %v488_v33 }
  0xee   : > { %493 = vrcp.f32 %v343_v34 }
  0xef   : > { %495 = vrcp.f32 %v345_v35 }
  0xf9   : > { %v490_v36 = vpop.eup %489 }
  0xfa   : > { %v492_v37 = vpop.eup %491 }
  0xfb   : > { %v494_v38 = vpop.eup %493 }
  0xfc   : > { %v496_v39 = vpop.eup %495  ;;  %v358_v40 = vcombine.low %v490_v36, %v494_v38 }
  0xfd   : > { %v359_v41 = vcombine.low %v492_v37, %v496_v39 }
  0xfe   : > { %362 = vst [vmem:[%s187_s27] sm:$0x77] %v358_v40 }
  0xff   : > { %363 = vst [vmem:[%s187_s27 + $0x8] sm:$0x77] %v359_v41 }
 0x100 PF: > { %s13_s12 = sadd.s32 1, %s503_s12  }
 0x101   : > { %p10_p4 = scmp.ge.s32.totalorder %s13_s12, 6  }
 0x103   :  { %12 = sbr.rel (!%p10_p4) target bundleno = 1 (0x1), region = 65 }

</bundles_post_ra>
